<compile_context>
chip_gen: v6e
topology: v6e:2x2x1
jax: 0.10.0
libtpu: 0.0.40
codegen_flags: <defaults>
</compile_context>

<pallas_src>
import math
import jax
import jax.numpy as jnp
from jax.experimental import pallas as pl
from jax.experimental.pallas import tpu as pltpu

# ---- small synthetic DistilBERT config ----
VOCAB    = 50
MAX_POS  = 16
DIM      = 32          # hidden size (CFG.text_embedding analogue, shrunk)
N_HEADS  = 4
HEAD_D   = DIM // N_HEADS
FFN_DIM  = 64
N_LAYERS = 2
LN_EPS   = 1e-12       # DistilBERT LayerNorm eps


# ---------------- in-kernel helpers ----------------

def _layernorm(x, g, b):
    mu = jnp.mean(x, axis=-1, keepdims=True)
    var = jnp.mean((x - mu) ** 2, axis=-1, keepdims=True)
    return (x - mu) * jax.lax.rsqrt(var + LN_EPS) * g + b


def _gelu(x):
    # TODO(synk): HF DistilBERT uses exact (erf) GELU; tanh approximation used here.
    c = math.sqrt(2.0 / math.pi)
    return 0.5 * x * (1.0 + jnp.tanh(c * (x + 0.044715 * x * x * x)))


# ---------------- fused encoder kernel (one grid step = one batch element) ----------------

def _encoder_kernel(x_ref, mb_ref,
                    emb_g_ref, emb_b_ref,
                    qkv_w_ref, qkv_b_ref, o_w_ref, o_b_ref,
                    sa_g_ref, sa_b_ref,
                    ff1_w_ref, ff1_b_ref, ff2_w_ref, ff2_b_ref,
                    out_g_ref, out_b_ref,
                    o_ref,
                    qkv_scr):
    x = x_ref[0]                              # (S, D)  word + position embeddings
    mask_bias = mb_ref[0]                     # (1, S)  additive: 0 keep / -1e9 masked

    # embedding LayerNorm (dropout = identity in eval)
    h = _layernorm(x, emb_g_ref[...], emb_b_ref[...])

    for l in range(N_LAYERS):                 # static unroll, N_LAYERS = 2
        # fused QKV projection; 1/sqrt(Dh) already folded into the Q columns.
        qkv_scr[...] = (jnp.dot(h, qkv_w_ref[l],
                                preferred_element_type=jnp.float32)
                        + qkv_b_ref[l])       # (S, 3D)

        attn = o_b_ref[l]                     # (1, D) -> broadcasts to (S, D)
        for hh in range(N_HEADS):             # in-kernel head split on the lane axis
            lo, hi = hh * HEAD_D, (hh + 1) * HEAD_D
            q_h = qkv_scr[:, lo:hi]                       # (S, Dh)
            k_h = qkv_scr[:, DIM + lo:DIM + hi]           # (S, Dh)
            v_h = qkv_scr[:, 2 * DIM + lo:2 * DIM + hi]   # (S, Dh)

            s = jnp.einsum('qd,kd->qk', q_h, k_h,
                           preferred_element_type=jnp.float32) + mask_bias
            s = s - jnp.max(s, axis=-1, keepdims=True)
            e = jnp.exp(s)
            p = e / jnp.sum(e, axis=-1, keepdims=True)
            ctx_h = jnp.dot(p, v_h, preferred_element_type=jnp.float32)   # (S, Dh)

            # per-head slice of output projection == concat(heads) @ W_o
            attn = attn + jnp.dot(ctx_h, o_w_ref[l, lo:hi, :],
                                  preferred_element_type=jnp.float32)

        h = _layernorm(h + attn, sa_g_ref[l], sa_b_ref[l])

        ff = jnp.dot(h, ff1_w_ref[l], preferred_element_type=jnp.float32) + ff1_b_ref[l]
        ff = _gelu(ff)
        ff = jnp.dot(ff, ff2_w_ref[l], preferred_element_type=jnp.float32) + ff2_b_ref[l]
        h = _layernorm(h + ff, out_g_ref[l], out_b_ref[l])

    # TextEncoder.forward returns last_hidden_state[:, 0, :]  (target_token_idx = 0)
    o_ref[0] = h[0:1, :]


# ---------------- model parameters (synthetic, deterministic) ----------------

def init_params(key):
    keys = iter(jax.random.split(key, 4 + N_LAYERS * 16))

    def nrm(shape, scale=0.02):
        return scale * jax.random.normal(next(keys), shape, dtype=jnp.float32)

    params = {
        'word_emb': nrm((VOCAB, DIM)),
        'pos_emb': nrm((MAX_POS, DIM)),
        'emb_ln_g': jnp.ones((DIM,), jnp.float32),
        'emb_ln_b': jnp.zeros((DIM,), jnp.float32),
        'layers': [],
    }
    for _ in range(N_LAYERS):
        params['layers'].append({
            'q_w': nrm((DIM, DIM)), 'q_b': jnp.zeros((DIM,), jnp.float32),
            'k_w': nrm((DIM, DIM)), 'k_b': jnp.zeros((DIM,), jnp.float32),
            'v_w': nrm((DIM, DIM)), 'v_b': jnp.zeros((DIM,), jnp.float32),
            'o_w': nrm((DIM, DIM)), 'o_b': jnp.zeros((DIM,), jnp.float32),
            'sa_ln_g': jnp.ones((DIM,), jnp.float32), 'sa_ln_b': jnp.zeros((DIM,), jnp.float32),
            'ff1_w': nrm((DIM, FFN_DIM)), 'ff1_b': jnp.zeros((FFN_DIM,), jnp.float32),
            'ff2_w': nrm((FFN_DIM, DIM)), 'ff2_b': jnp.zeros((DIM,), jnp.float32),
            'out_ln_g': jnp.ones((DIM,), jnp.float32), 'out_ln_b': jnp.zeros((DIM,), jnp.float32),
        })
    return params


def pack_params(params):
    """Stack per-layer weights and fold scaling so the kernel sees few, dense arrays."""
    scale = 1.0 / math.sqrt(HEAD_D)
    L = params['layers']
    return {
        'word_emb': params['word_emb'],
        'pos_emb': params['pos_emb'],
        'emb_ln_g': params['emb_ln_g'].reshape(1, DIM),
        'emb_ln_b': params['emb_ln_b'].reshape(1, DIM),
        # fused QKV, with 1/sqrt(Dh) folded into the Q part
        'qkv_w': jnp.stack([jnp.concatenate([l['q_w'] * scale, l['k_w'], l['v_w']], axis=1)
                            for l in L]),                               # (L, D, 3D)
        'qkv_b': jnp.stack([jnp.concatenate([l['q_b'] * scale, l['k_b'], l['v_b']])[None, :]
                            for l in L]),                               # (L, 1, 3D)
        'o_w': jnp.stack([l['o_w'] for l in L]),                        # (L, D, D)
        'o_b': jnp.stack([l['o_b'][None, :] for l in L]),               # (L, 1, D)
        'sa_ln_g': jnp.stack([l['sa_ln_g'][None, :] for l in L]),
        'sa_ln_b': jnp.stack([l['sa_ln_b'][None, :] for l in L]),
        'ff1_w': jnp.stack([l['ff1_w'] for l in L]),                    # (L, D, F)
        'ff1_b': jnp.stack([l['ff1_b'][None, :] for l in L]),           # (L, 1, F)
        'ff2_w': jnp.stack([l['ff2_w'] for l in L]),                    # (L, F, D)
        'ff2_b': jnp.stack([l['ff2_b'][None, :] for l in L]),           # (L, 1, D)
        'out_ln_g': jnp.stack([l['out_ln_g'][None, :] for l in L]),
        'out_ln_b': jnp.stack([l['out_ln_b'][None, :] for l in L]),
    }


# ---------------- TextEncoder forward ----------------

def text_encoder_forward(packed, input_ids, attention_mask):
    B, S = input_ids.shape

    # Embedding gather (data-dependent lookup) stays in XLA; everything after
    # it runs in one fused Pallas kernel.
    emb = jnp.take(packed['word_emb'], input_ids, axis=0) + packed['pos_emb'][None, :S, :]
    # additive mask bias: 0 where attended, -1e9 where masked
    mask_bias = ((attention_mask.astype(jnp.float32) - 1.0) * 1e9).reshape(B, 1, S)

    def wspec(shape):
        return pl.BlockSpec(shape, lambda b, _s=shape: (0,) * len(_s))

    out = pl.pallas_call(
        _encoder_kernel,
        out_shape=jax.ShapeDtypeStruct((B, 1, DIM), jnp.float32),
        grid=(B,),
        in_specs=[
            pl.BlockSpec((1, S, DIM), lambda b: (b, 0, 0)),      # embeddings
            pl.BlockSpec((1, 1, S), lambda b: (b, 0, 0)),        # mask bias
            wspec((1, DIM)), wspec((1, DIM)),                    # emb LN
            wspec((N_LAYERS, DIM, 3 * DIM)), wspec((N_LAYERS, 1, 3 * DIM)),
            wspec((N_LAYERS, DIM, DIM)), wspec((N_LAYERS, 1, DIM)),
            wspec((N_LAYERS, 1, DIM)), wspec((N_LAYERS, 1, DIM)),
            wspec((N_LAYERS, DIM, FFN_DIM)), wspec((N_LAYERS, 1, FFN_DIM)),
            wspec((N_LAYERS, FFN_DIM, DIM)), wspec((N_LAYERS, 1, DIM)),
            wspec((N_LAYERS, 1, DIM)), wspec((N_LAYERS, 1, DIM)),
        ],
        out_specs=pl.BlockSpec((1, 1, DIM), lambda b: (b, 0, 0)),
        scratch_shapes=[pltpu.VMEM((S, 3 * DIM), jnp.float32)],  # fused QKV scratch
        compiler_params=pltpu.CompilerParams(
            dimension_semantics=("parallel",)),
    )(emb, mask_bias,
      packed['emb_ln_g'], packed['emb_ln_b'],
      packed['qkv_w'], packed['qkv_b'], packed['o_w'], packed['o_b'],
      packed['sa_ln_g'], packed['sa_ln_b'],
      packed['ff1_w'], packed['ff1_b'], packed['ff2_w'], packed['ff2_b'],
      packed['out_ln_g'], packed['out_ln_b'])

    return out[:, 0, :]                                          # (B, DIM)


if __name__ == "__main__":
    key = jax.random.PRNGKey(0)
    pkey, ikey = jax.random.split(key)
    params = init_params(pkey)
    packed = pack_params(params)

    B, S = 2, 8
    input_ids = jax.random.randint(ikey, (B, S), 0, VOCAB, dtype=jnp.int32)
    attention_mask = jnp.array([[1, 1, 1, 1, 1, 1, 1, 1],
                                [1, 1, 1, 1, 1, 1, 0, 0]], dtype=jnp.int32)

    out = jax.jit(text_encoder_forward)(packed, input_ids, attention_mask)
    out = jax.block_until_ready(out)
    assert out.shape == (B, DIM) and out.dtype == jnp.float32
    print("KERNEL_OK")
</pallas_src>

<mosaic_0001>
module attributes {stable_mosaic.version = 11 : i64} {
  func.func @_encoder_kernel(%arg0: i32, %arg1: memref<1x8x32xf32, #tpu.memory_space<vmem>>, %arg2: memref<1x1x8xf32, #tpu.memory_space<vmem>>, %arg3: memref<1x32xf32, #tpu.memory_space<vmem>>, %arg4: memref<1x32xf32, #tpu.memory_space<vmem>>, %arg5: memref<2x32x96xf32, #tpu.memory_space<vmem>>, %arg6: memref<2x1x96xf32, #tpu.memory_space<vmem>>, %arg7: memref<2x32x32xf32, #tpu.memory_space<vmem>>, %arg8: memref<2x1x32xf32, #tpu.memory_space<vmem>>, %arg9: memref<2x1x32xf32, #tpu.memory_space<vmem>>, %arg10: memref<2x1x32xf32, #tpu.memory_space<vmem>>, %arg11: memref<2x32x64xf32, #tpu.memory_space<vmem>>, %arg12: memref<2x1x64xf32, #tpu.memory_space<vmem>>, %arg13: memref<2x64x32xf32, #tpu.memory_space<vmem>>, %arg14: memref<2x1x32xf32, #tpu.memory_space<vmem>>, %arg15: memref<2x1x32xf32, #tpu.memory_space<vmem>>, %arg16: memref<2x1x32xf32, #tpu.memory_space<vmem>>, %arg17: memref<1x1x32xf32, #tpu.memory_space<vmem>>, %arg18: memref<8x96xf32, #tpu.memory_space<vmem>>) attributes {dimension_semantics = [#tpu.dimension_semantics<parallel>], iteration_bounds = array<i64: 2>, scalar_prefetch = 0 : i64, scratch_operands = 1 : i64, tpu.core_type = #tpu.core_type<tc>, window_params = [{transform_indices = @transform_0, window_bounds = array<i64: 1, 8, 32>}, {transform_indices = @transform_1, window_bounds = array<i64: 1, 1, 8>}, {pipeline_mode = #tpu.pipeline_mode<synchronous>, transform_indices = @transform_2, window_bounds = array<i64: 1, 32>}, {pipeline_mode = #tpu.pipeline_mode<synchronous>, transform_indices = @transform_3, window_bounds = array<i64: 1, 32>}, {pipeline_mode = #tpu.pipeline_mode<synchronous>, transform_indices = @transform_4, window_bounds = array<i64: 2, 32, 96>}, {pipeline_mode = #tpu.pipeline_mode<synchronous>, transform_indices = @transform_5, window_bounds = array<i64: 2, 1, 96>}, {pipeline_mode = #tpu.pipeline_mode<synchronous>, transform_indices = @transform_6, window_bounds = array<i64: 2, 32, 32>}, {pipeline_mode = #tpu.pipeline_mode<synchronous>, transform_indices = @transform_7, window_bounds = array<i64: 2, 1, 32>}, {pipeline_mode = #tpu.pipeline_mode<synchronous>, transform_indices = @transform_8, window_bounds = array<i64: 2, 1, 32>}, {pipeline_mode = #tpu.pipeline_mode<synchronous>, transform_indices = @transform_9, window_bounds = array<i64: 2, 1, 32>}, {pipeline_mode = #tpu.pipeline_mode<synchronous>, transform_indices = @transform_10, window_bounds = array<i64: 2, 32, 64>}, {pipeline_mode = #tpu.pipeline_mode<synchronous>, transform_indices = @transform_11, window_bounds = array<i64: 2, 1, 64>}, {pipeline_mode = #tpu.pipeline_mode<synchronous>, transform_indices = @transform_12, window_bounds = array<i64: 2, 64, 32>}, {pipeline_mode = #tpu.pipeline_mode<synchronous>, transform_indices = @transform_13, window_bounds = array<i64: 2, 1, 32>}, {pipeline_mode = #tpu.pipeline_mode<synchronous>, transform_indices = @transform_14, window_bounds = array<i64: 2, 1, 32>}, {pipeline_mode = #tpu.pipeline_mode<synchronous>, transform_indices = @transform_15, window_bounds = array<i64: 2, 1, 32>}, {transform_indices = @transform_16, window_bounds = array<i64: 1, 1, 32>}]} {
    %c0 = arith.constant 0 : index
    %c0_0 = arith.constant 0 : index
    %c0_1 = arith.constant 0 : index
    %0 = vector.load %arg1[%c0, %c0_0, %c0_1] : memref<1x8x32xf32, #tpu.memory_space<vmem>>, vector<1x8x32xf32>
    %1 = vector.shape_cast %0 : vector<1x8x32xf32> to vector<8x32xf32>
    %c0_2 = arith.constant 0 : index
    %c0_3 = arith.constant 0 : index
    %c0_4 = arith.constant 0 : index
    %2 = vector.load %arg2[%c0_2, %c0_3, %c0_4] : memref<1x1x8xf32, #tpu.memory_space<vmem>>, vector<1x1x8xf32>
    %3 = vector.shape_cast %2 : vector<1x1x8xf32> to vector<1x8xf32>
    %c0_5 = arith.constant 0 : index
    %c0_6 = arith.constant 0 : index
    %4 = vector.load %arg3[%c0_5, %c0_6] : memref<1x32xf32, #tpu.memory_space<vmem>>, vector<1x32xf32>
    %c0_7 = arith.constant 0 : index
    %c0_8 = arith.constant 0 : index
    %5 = vector.load %arg4[%c0_7, %c0_8] : memref<1x32xf32, #tpu.memory_space<vmem>>, vector<1x32xf32>
    %cst = arith.constant dense<0.000000e+00> : vector<8xf32>
    %6 = vector.multi_reduction <add>, %1, %cst [1] : vector<8x32xf32> to vector<8xf32>
    %7 = vector.shape_cast %6 : vector<8xf32> to vector<8x1xf32>
    %cst_9 = arith.constant 3.200000e+01 : f32
    %8 = vector.broadcast %cst_9 : f32 to vector<8x1xf32>
    %9 = arith.divf %7, %8 : vector<8x1xf32>
    %10 = vector.broadcast %9 : vector<8x1xf32> to vector<8x32xf32>
    %11 = arith.subf %1, %10 : vector<8x32xf32>
    %12 = arith.mulf %11, %11 : vector<8x32xf32>
    %cst_10 = arith.constant dense<0.000000e+00> : vector<8xf32>
    %13 = vector.multi_reduction <add>, %12, %cst_10 [1] : vector<8x32xf32> to vector<8xf32>
    %14 = vector.shape_cast %13 : vector<8xf32> to vector<8x1xf32>
    %cst_11 = arith.constant 3.200000e+01 : f32
    %15 = vector.broadcast %cst_11 : f32 to vector<8x1xf32>
    %16 = arith.divf %14, %15 : vector<8x1xf32>
    %17 = vector.broadcast %9 : vector<8x1xf32> to vector<8x32xf32>
    %18 = arith.subf %1, %17 : vector<8x32xf32>
    %cst_12 = arith.constant 9.99999996E-13 : f32
    %19 = vector.broadcast %cst_12 : f32 to vector<8x1xf32>
    %20 = arith.addf %16, %19 : vector<8x1xf32>
    %21 = math.rsqrt %20 : vector<8x1xf32>
    %22 = vector.broadcast %21 : vector<8x1xf32> to vector<8x32xf32>
    %23 = arith.mulf %18, %22 : vector<8x32xf32>
    %24 = vector.broadcast %4 : vector<1x32xf32> to vector<8x32xf32>
    %25 = arith.mulf %23, %24 : vector<8x32xf32>
    %26 = vector.broadcast %5 : vector<1x32xf32> to vector<8x32xf32>
    %27 = arith.addf %25, %26 : vector<8x32xf32>
    %c0_13 = arith.constant 0 : index
    %c0_14 = arith.constant 0 : index
    %c0_15 = arith.constant 0 : index
    %28 = vector.load %arg5[%c0_13, %c0_14, %c0_15] : memref<2x32x96xf32, #tpu.memory_space<vmem>>, vector<1x32x96xf32>
    %29 = vector.shape_cast %28 : vector<1x32x96xf32> to vector<32x96xf32>
    %cst_16 = arith.constant dense<0.000000e+00> : vector<8x96xf32>
    %30 = tpu.matmul %27, %29, %cst_16 {dimension_numbers = #tpu.dot_dimension_numbers<[1], [0], [0], [1], [0, 0, 1, 1], [], []>} : vector<8x32xf32>, vector<32x96xf32>, vector<8x96xf32> -> vector<8x96xf32>
    %c0_17 = arith.constant 0 : index
    %c0_18 = arith.constant 0 : index
    %c0_19 = arith.constant 0 : index
    %31 = vector.load %arg6[%c0_17, %c0_18, %c0_19] : memref<2x1x96xf32, #tpu.memory_space<vmem>>, vector<1x1x96xf32>
    %32 = vector.shape_cast %31 : vector<1x1x96xf32> to vector<1x96xf32>
    %33 = vector.broadcast %32 : vector<1x96xf32> to vector<8x96xf32>
    %34 = arith.addf %30, %33 : vector<8x96xf32>
    %c0_20 = arith.constant 0 : index
    %c0_21 = arith.constant 0 : index
    %35 = vector.load %arg18[%c0_20, %c0_21] : memref<8x96xf32, #tpu.memory_space<vmem>>, vector<8x96xf32>
    tpu.vector_store %arg18[%c0_20, %c0_21], %34 {strides = array<i32>} : memref<8x96xf32, #tpu.memory_space<vmem>>, vector<8x96xf32>,
    %c0_22 = arith.constant 0 : index
    %c0_23 = arith.constant 0 : index
    %c0_24 = arith.constant 0 : index
    %36 = vector.load %arg8[%c0_22, %c0_23, %c0_24] : memref<2x1x32xf32, #tpu.memory_space<vmem>>, vector<1x1x32xf32>
    %37 = vector.shape_cast %36 : vector<1x1x32xf32> to vector<1x32xf32>
    %c0_25 = arith.constant 0 : index
    %c0_26 = arith.constant 0 : index
    %38 = vector.load %arg18[%c0_25, %c0_26] : memref<8x96xf32, #tpu.memory_space<vmem>>, vector<8x8xf32>
    %c0_27 = arith.constant 0 : index
    %c32 = arith.constant 32 : index
    %39 = vector.load %arg18[%c0_27, %c32] : memref<8x96xf32, #tpu.memory_space<vmem>>, vector<8x8xf32>
    %c0_28 = arith.constant 0 : index
    %c64 = arith.constant 64 : index
    %40 = vector.load %arg18[%c0_28, %c64] : memref<8x96xf32, #tpu.memory_space<vmem>>, vector<8x8xf32>
    "tpu.trace_start"() <{level = 10 : i32, message = "qd,kd->qk"}> : () -> ()
    %cst_29 = arith.constant dense<0.000000e+00> : vector<8x8xf32>
    %41 = tpu.matmul %38, %39, %cst_29 {dimension_numbers = #tpu.dot_dimension_numbers<[1], [1], [0], [0], [0, 0, 1, 0], [], []>} : vector<8x8xf32>, vector<8x8xf32>, vector<8x8xf32> -> vector<8x8xf32>
    "tpu.trace_stop"() : () -> ()
    %42 = vector.broadcast %3 : vector<1x8xf32> to vector<8x8xf32>
    %43 = arith.addf %41, %42 : vector<8x8xf32>
    %cst_30 = arith.constant dense<0xFF800000> : vector<8xf32>
    %44 = vector.multi_reduction <maximumf>, %43, %cst_30 [1] : vector<8x8xf32> to vector<8xf32>
    %45 = vector.shape_cast %44 : vector<8xf32> to vector<8x1xf32>
    %46 = vector.broadcast %45 : vector<8x1xf32> to vector<8x8xf32>
    %47 = arith.subf %43, %46 : vector<8x8xf32>
    %48 = math.exp %47 : vector<8x8xf32>
    %cst_31 = arith.constant dense<0.000000e+00> : vector<8xf32>
    %49 = vector.multi_reduction <add>, %48, %cst_31 [1] : vector<8x8xf32> to vector<8xf32>
    %50 = vector.shape_cast %49 : vector<8xf32> to vector<8x1xf32>
    %51 = vector.broadcast %50 : vector<8x1xf32> to vector<8x8xf32>
    %52 = arith.divf %48, %51 : vector<8x8xf32>
    %cst_32 = arith.constant dense<0.000000e+00> : vector<8x8xf32>
    %53 = tpu.matmul %52, %40, %cst_32 {dimension_numbers = #tpu.dot_dimension_numbers<[1], [0], [0], [1], [0, 0, 1, 1], [], []>} : vector<8x8xf32>, vector<8x8xf32>, vector<8x8xf32> -> vector<8x8xf32>
    %c0_33 = arith.constant 0 : index
    %c0_34 = arith.constant 0 : index
    %c0_35 = arith.constant 0 : index
    %54 = vector.load %arg7[%c0_33, %c0_34, %c0_35] : memref<2x32x32xf32, #tpu.memory_space<vmem>>, vector<1x8x32xf32>
    %55 = vector.shape_cast %54 : vector<1x8x32xf32> to vector<8x32xf32>
    %cst_36 = arith.constant dense<0.000000e+00> : vector<8x32xf32>
    %56 = tpu.matmul %53, %55, %cst_36 {dimension_numbers = #tpu.dot_dimension_numbers<[1], [0], [0], [1], [0, 0, 1, 1], [], []>} : vector<8x8xf32>, vector<8x32xf32>, vector<8x32xf32> -> vector<8x32xf32>
    %57 = vector.broadcast %37 : vector<1x32xf32> to vector<8x32xf32>
    %58 = arith.addf %57, %56 : vector<8x32xf32>
    %c0_37 = arith.constant 0 : index
    %c8 = arith.constant 8 : index
    %59 = vector.load %arg18[%c0_37, %c8] : memref<8x96xf32, #tpu.memory_space<vmem>>, vector<8x8xf32>
    %c0_38 = arith.constant 0 : index
    %c40 = arith.constant 40 : index
    %60 = vector.load %arg18[%c0_38, %c40] : memref<8x96xf32, #tpu.memory_space<vmem>>, vector<8x8xf32>
    %c0_39 = arith.constant 0 : index
    %c72 = arith.constant 72 : index
    %61 = vector.load %arg18[%c0_39, %c72] : memref<8x96xf32, #tpu.memory_space<vmem>>, vector<8x8xf32>
    "tpu.trace_start"() <{level = 10 : i32, message = "qd,kd->qk"}> : () -> ()
    %cst_40 = arith.constant dense<0.000000e+00> : vector<8x8xf32>
    %62 = tpu.matmul %59, %60, %cst_40 {dimension_numbers = #tpu.dot_dimension_numbers<[1], [1], [0], [0], [0, 0, 1, 0], [], []>} : vector<8x8xf32>, vector<8x8xf32>, vector<8x8xf32> -> vector<8x8xf32>
    "tpu.trace_stop"() : () -> ()
    %63 = vector.broadcast %3 : vector<1x8xf32> to vector<8x8xf32>
    %64 = arith.addf %62, %63 : vector<8x8xf32>
    %cst_41 = arith.constant dense<0xFF800000> : vector<8xf32>
    %65 = vector.multi_reduction <maximumf>, %64, %cst_41 [1] : vector<8x8xf32> to vector<8xf32>
    %66 = vector.shape_cast %65 : vector<8xf32> to vector<8x1xf32>
    %67 = vector.broadcast %66 : vector<8x1xf32> to vector<8x8xf32>
    %68 = arith.subf %64, %67 : vector<8x8xf32>
    %69 = math.exp %68 : vector<8x8xf32>
    %cst_42 = arith.constant dense<0.000000e+00> : vector<8xf32>
    %70 = vector.multi_reduction <add>, %69, %cst_42 [1] : vector<8x8xf32> to vector<8xf32>
    %71 = vector.shape_cast %70 : vector<8xf32> to vector<8x1xf32>
    %72 = vector.broadcast %71 : vector<8x1xf32> to vector<8x8xf32>
    %73 = arith.divf %69, %72 : vector<8x8xf32>
    %cst_43 = arith.constant dense<0.000000e+00> : vector<8x8xf32>
    %74 = tpu.matmul %73, %61, %cst_43 {dimension_numbers = #tpu.dot_dimension_numbers<[1], [0], [0], [1], [0, 0, 1, 1], [], []>} : vector<8x8xf32>, vector<8x8xf32>, vector<8x8xf32> -> vector<8x8xf32>
    %c0_44 = arith.constant 0 : index
    %c8_45 = arith.constant 8 : index
    %c0_46 = arith.constant 0 : index
    %75 = vector.load %arg7[%c0_44, %c8_45, %c0_46] : memref<2x32x32xf32, #tpu.memory_space<vmem>>, vector<1x8x32xf32>
    %76 = vector.shape_cast %75 : vector<1x8x32xf32> to vector<8x32xf32>
    %cst_47 = arith.constant dense<0.000000e+00> : vector<8x32xf32>
    %77 = tpu.matmul %74, %76, %cst_47 {dimension_numbers = #tpu.dot_dimension_numbers<[1], [0], [0], [1], [0, 0, 1, 1], [], []>} : vector<8x8xf32>, vector<8x32xf32>, vector<8x32xf32> -> vector<8x32xf32>
    %78 = arith.addf %58, %77 : vector<8x32xf32>
    %c0_48 = arith.constant 0 : index
    %c16 = arith.constant 16 : index
    %79 = vector.load %arg18[%c0_48, %c16] : memref<8x96xf32, #tpu.memory_space<vmem>>, vector<8x8xf32>
    %c0_49 = arith.constant 0 : index
    %c48 = arith.constant 48 : index
    %80 = vector.load %arg18[%c0_49, %c48] : memref<8x96xf32, #tpu.memory_space<vmem>>, vector<8x8xf32>
    %c0_50 = arith.constant 0 : index
    %c80 = arith.constant 80 : index
    %81 = vector.load %arg18[%c0_50, %c80] : memref<8x96xf32, #tpu.memory_space<vmem>>, vector<8x8xf32>
    "tpu.trace_start"() <{level = 10 : i32, message = "qd,kd->qk"}> : () -> ()
    %cst_51 = arith.constant dense<0.000000e+00> : vector<8x8xf32>
    %82 = tpu.matmul %79, %80, %cst_51 {dimension_numbers = #tpu.dot_dimension_numbers<[1], [1], [0], [0], [0, 0, 1, 0], [], []>} : vector<8x8xf32>, vector<8x8xf32>, vector<8x8xf32> -> vector<8x8xf32>
    "tpu.trace_stop"() : () -> ()
    %83 = vector.broadcast %3 : vector<1x8xf32> to vector<8x8xf32>
    %84 = arith.addf %82, %83 : vector<8x8xf32>
    %cst_52 = arith.constant dense<0xFF800000> : vector<8xf32>
    %85 = vector.multi_reduction <maximumf>, %84, %cst_52 [1] : vector<8x8xf32> to vector<8xf32>
    %86 = vector.shape_cast %85 : vector<8xf32> to vector<8x1xf32>
    %87 = vector.broadcast %86 : vector<8x1xf32> to vector<8x8xf32>
    %88 = arith.subf %84, %87 : vector<8x8xf32>
    %89 = math.exp %88 : vector<8x8xf32>
    %cst_53 = arith.constant dense<0.000000e+00> : vector<8xf32>
    %90 = vector.multi_reduction <add>, %89, %cst_53 [1] : vector<8x8xf32> to vector<8xf32>
    %91 = vector.shape_cast %90 : vector<8xf32> to vector<8x1xf32>
    %92 = vector.broadcast %91 : vector<8x1xf32> to vector<8x8xf32>
    %93 = arith.divf %89, %92 : vector<8x8xf32>
    %cst_54 = arith.constant dense<0.000000e+00> : vector<8x8xf32>
    %94 = tpu.matmul %93, %81, %cst_54 {dimension_numbers = #tpu.dot_dimension_numbers<[1], [0], [0], [1], [0, 0, 1, 1], [], []>} : vector<8x8xf32>, vector<8x8xf32>, vector<8x8xf32> -> vector<8x8xf32>
    %c0_55 = arith.constant 0 : index
    %c16_56 = arith.constant 16 : index
    %c0_57 = arith.constant 0 : index
    %95 = vector.load %arg7[%c0_55, %c16_56, %c0_57] : memref<2x32x32xf32, #tpu.memory_space<vmem>>, vector<1x8x32xf32>
    %96 = vector.shape_cast %95 : vector<1x8x32xf32> to vector<8x32xf32>
    %cst_58 = arith.constant dense<0.000000e+00> : vector<8x32xf32>
    %97 = tpu.matmul %94, %96, %cst_58 {dimension_numbers = #tpu.dot_dimension_numbers<[1], [0], [0], [1], [0, 0, 1, 1], [], []>} : vector<8x8xf32>, vector<8x32xf32>, vector<8x32xf32> -> vector<8x32xf32>
    %98 = arith.addf %78, %97 : vector<8x32xf32>
    %c0_59 = arith.constant 0 : index
    %c24 = arith.constant 24 : index
    %99 = vector.load %arg18[%c0_59, %c24] : memref<8x96xf32, #tpu.memory_space<vmem>>, vector<8x8xf32>
    %c0_60 = arith.constant 0 : index
    %c56 = arith.constant 56 : index
    %100 = vector.load %arg18[%c0_60, %c56] : memref<8x96xf32, #tpu.memory_space<vmem>>, vector<8x8xf32>
    %c0_61 = arith.constant 0 : index
    %c88 = arith.constant 88 : index
    %101 = vector.load %arg18[%c0_61, %c88] : memref<8x96xf32, #tpu.memory_space<vmem>>, vector<8x8xf32>
    "tpu.trace_start"() <{level = 10 : i32, message = "qd,kd->qk"}> : () -> ()
    %cst_62 = arith.constant dense<0.000000e+00> : vector<8x8xf32>
    %102 = tpu.matmul %99, %100, %cst_62 {dimension_numbers = #tpu.dot_dimension_numbers<[1], [1], [0], [0], [0, 0, 1, 0], [], []>} : vector<8x8xf32>, vector<8x8xf32>, vector<8x8xf32> -> vector<8x8xf32>
    "tpu.trace_stop"() : () -> ()
    %103 = vector.broadcast %3 : vector<1x8xf32> to vector<8x8xf32>
    %104 = arith.addf %102, %103 : vector<8x8xf32>
    %cst_63 = arith.constant dense<0xFF800000> : vector<8xf32>
    %105 = vector.multi_reduction <maximumf>, %104, %cst_63 [1] : vector<8x8xf32> to vector<8xf32>
    %106 = vector.shape_cast %105 : vector<8xf32> to vector<8x1xf32>
    %107 = vector.broadcast %106 : vector<8x1xf32> to vector<8x8xf32>
    %108 = arith.subf %104, %107 : vector<8x8xf32>
    %109 = math.exp %108 : vector<8x8xf32>
    %cst_64 = arith.constant dense<0.000000e+00> : vector<8xf32>
    %110 = vector.multi_reduction <add>, %109, %cst_64 [1] : vector<8x8xf32> to vector<8xf32>
    %111 = vector.shape_cast %110 : vector<8xf32> to vector<8x1xf32>
    %112 = vector.broadcast %111 : vector<8x1xf32> to vector<8x8xf32>
    %113 = arith.divf %109, %112 : vector<8x8xf32>
    %cst_65 = arith.constant dense<0.000000e+00> : vector<8x8xf32>
    %114 = tpu.matmul %113, %101, %cst_65 {dimension_numbers = #tpu.dot_dimension_numbers<[1], [0], [0], [1], [0, 0, 1, 1], [], []>} : vector<8x8xf32>, vector<8x8xf32>, vector<8x8xf32> -> vector<8x8xf32>
    %c0_66 = arith.constant 0 : index
    %c24_67 = arith.constant 24 : index
    %c0_68 = arith.constant 0 : index
    %115 = vector.load %arg7[%c0_66, %c24_67, %c0_68] : memref<2x32x32xf32, #tpu.memory_space<vmem>>, vector<1x8x32xf32>
    %116 = vector.shape_cast %115 : vector<1x8x32xf32> to vector<8x32xf32>
    %cst_69 = arith.constant dense<0.000000e+00> : vector<8x32xf32>
    %117 = tpu.matmul %114, %116, %cst_69 {dimension_numbers = #tpu.dot_dimension_numbers<[1], [0], [0], [1], [0, 0, 1, 1], [], []>} : vector<8x8xf32>, vector<8x32xf32>, vector<8x32xf32> -> vector<8x32xf32>
    %118 = arith.addf %98, %117 : vector<8x32xf32>
    %119 = arith.addf %27, %118 : vector<8x32xf32>
    %c0_70 = arith.constant 0 : index
    %c0_71 = arith.constant 0 : index
    %c0_72 = arith.constant 0 : index
    %120 = vector.load %arg9[%c0_70, %c0_71, %c0_72] : memref<2x1x32xf32, #tpu.memory_space<vmem>>, vector<1x1x32xf32>
    %121 = vector.shape_cast %120 : vector<1x1x32xf32> to vector<1x32xf32>
    %c0_73 = arith.constant 0 : index
    %c0_74 = arith.constant 0 : index
    %c0_75 = arith.constant 0 : index
    %122 = vector.load %arg10[%c0_73, %c0_74, %c0_75] : memref<2x1x32xf32, #tpu.memory_space<vmem>>, vector<1x1x32xf32>
    %123 = vector.shape_cast %122 : vector<1x1x32xf32> to vector<1x32xf32>
    %cst_76 = arith.constant dense<0.000000e+00> : vector<8xf32>
    %124 = vector.multi_reduction <add>, %119, %cst_76 [1] : vector<8x32xf32> to vector<8xf32>
    %125 = vector.shape_cast %124 : vector<8xf32> to vector<8x1xf32>
    %cst_77 = arith.constant 3.200000e+01 : f32
    %126 = vector.broadcast %cst_77 : f32 to vector<8x1xf32>
    %127 = arith.divf %125, %126 : vector<8x1xf32>
    %128 = vector.broadcast %127 : vector<8x1xf32> to vector<8x32xf32>
    %129 = arith.subf %119, %128 : vector<8x32xf32>
    %130 = arith.mulf %129, %129 : vector<8x32xf32>
    %cst_78 = arith.constant dense<0.000000e+00> : vector<8xf32>
    %131 = vector.multi_reduction <add>, %130, %cst_78 [1] : vector<8x32xf32> to vector<8xf32>
    %132 = vector.shape_cast %131 : vector<8xf32> to vector<8x1xf32>
    %cst_79 = arith.constant 3.200000e+01 : f32
    %133 = vector.broadcast %cst_79 : f32 to vector<8x1xf32>
    %134 = arith.divf %132, %133 : vector<8x1xf32>
    %135 = vector.broadcast %127 : vector<8x1xf32> to vector<8x32xf32>
    %136 = arith.subf %119, %135 : vector<8x32xf32>
    %cst_80 = arith.constant 9.99999996E-13 : f32
    %137 = vector.broadcast %cst_80 : f32 to vector<8x1xf32>
    %138 = arith.addf %134, %137 : vector<8x1xf32>
    %139 = math.rsqrt %138 : vector<8x1xf32>
    %140 = vector.broadcast %139 : vector<8x1xf32> to vector<8x32xf32>
    %141 = arith.mulf %136, %140 : vector<8x32xf32>
    %142 = vector.broadcast %121 : vector<1x32xf32> to vector<8x32xf32>
    %143 = arith.mulf %141, %142 : vector<8x32xf32>
    %144 = vector.broadcast %123 : vector<1x32xf32> to vector<8x32xf32>
    %145 = arith.addf %143, %144 : vector<8x32xf32>
    %c0_81 = arith.constant 0 : index
    %c0_82 = arith.constant 0 : index
    %c0_83 = arith.constant 0 : index
    %146 = vector.load %arg11[%c0_81, %c0_82, %c0_83] : memref<2x32x64xf32, #tpu.memory_space<vmem>>, vector<1x32x64xf32>
    %147 = vector.shape_cast %146 : vector<1x32x64xf32> to vector<32x64xf32>
    %cst_84 = arith.constant dense<0.000000e+00> : vector<8x64xf32>
    %148 = tpu.matmul %145, %147, %cst_84 {dimension_numbers = #tpu.dot_dimension_numbers<[1], [0], [0], [1], [0, 0, 1, 1], [], []>} : vector<8x32xf32>, vector<32x64xf32>, vector<8x64xf32> -> vector<8x64xf32>
    %c0_85 = arith.constant 0 : index
    %c0_86 = arith.constant 0 : index
    %c0_87 = arith.constant 0 : index
    %149 = vector.load %arg12[%c0_85, %c0_86, %c0_87] : memref<2x1x64xf32, #tpu.memory_space<vmem>>, vector<1x1x64xf32>
    %150 = vector.shape_cast %149 : vector<1x1x64xf32> to vector<1x64xf32>
    %151 = vector.broadcast %150 : vector<1x64xf32> to vector<8x64xf32>
    %152 = arith.addf %148, %151 : vector<8x64xf32>
    %cst_88 = arith.constant 5.000000e-01 : f32
    %153 = vector.broadcast %cst_88 : f32 to vector<8x64xf32>
    %154 = arith.mulf %153, %152 : vector<8x64xf32>
    %cst_89 = arith.constant 4.471500e-02 : f32
    %155 = vector.broadcast %cst_89 : f32 to vector<8x64xf32>
    %156 = arith.mulf %155, %152 : vector<8x64xf32>
    %157 = arith.mulf %156, %152 : vector<8x64xf32>
    %158 = arith.mulf %157, %152 : vector<8x64xf32>
    %159 = arith.addf %152, %158 : vector<8x64xf32>
    %cst_90 = arith.constant 0.797884583 : f32
    %160 = vector.broadcast %cst_90 : f32 to vector<8x64xf32>
    %161 = arith.mulf %160, %159 : vector<8x64xf32>
    %162 = math.tanh %161 : vector<8x64xf32>
    %cst_91 = arith.constant 1.000000e+00 : f32
    %163 = vector.broadcast %cst_91 : f32 to vector<8x64xf32>
    %164 = arith.addf %163, %162 : vector<8x64xf32>
    %165 = arith.mulf %154, %164 : vector<8x64xf32>
    %c0_92 = arith.constant 0 : index
    %c0_93 = arith.constant 0 : index
    %c0_94 = arith.constant 0 : index
    %166 = vector.load %arg13[%c0_92, %c0_93, %c0_94] : memref<2x64x32xf32, #tpu.memory_space<vmem>>, vector<1x64x32xf32>
    %167 = vector.shape_cast %166 : vector<1x64x32xf32> to vector<64x32xf32>
    %cst_95 = arith.constant dense<0.000000e+00> : vector<8x32xf32>
    %168 = tpu.matmul %165, %167, %cst_95 {dimension_numbers = #tpu.dot_dimension_numbers<[1], [0], [0], [1], [0, 0, 1, 1], [], []>} : vector<8x64xf32>, vector<64x32xf32>, vector<8x32xf32> -> vector<8x32xf32>
    %c0_96 = arith.constant 0 : index
    %c0_97 = arith.constant 0 : index
    %c0_98 = arith.constant 0 : index
    %169 = vector.load %arg14[%c0_96, %c0_97, %c0_98] : memref<2x1x32xf32, #tpu.memory_space<vmem>>, vector<1x1x32xf32>
    %170 = vector.shape_cast %169 : vector<1x1x32xf32> to vector<1x32xf32>
    %171 = vector.broadcast %170 : vector<1x32xf32> to vector<8x32xf32>
    %172 = arith.addf %168, %171 : vector<8x32xf32>
    %173 = arith.addf %145, %172 : vector<8x32xf32>
    %c0_99 = arith.constant 0 : index
    %c0_100 = arith.constant 0 : index
    %c0_101 = arith.constant 0 : index
    %174 = vector.load %arg15[%c0_99, %c0_100, %c0_101] : memref<2x1x32xf32, #tpu.memory_space<vmem>>, vector<1x1x32xf32>
    %175 = vector.shape_cast %174 : vector<1x1x32xf32> to vector<1x32xf32>
    %c0_102 = arith.constant 0 : index
    %c0_103 = arith.constant 0 : index
    %c0_104 = arith.constant 0 : index
    %176 = vector.load %arg16[%c0_102, %c0_103, %c0_104] : memref<2x1x32xf32, #tpu.memory_space<vmem>>, vector<1x1x32xf32>
    %177 = vector.shape_cast %176 : vector<1x1x32xf32> to vector<1x32xf32>
    %cst_105 = arith.constant dense<0.000000e+00> : vector<8xf32>
    %178 = vector.multi_reduction <add>, %173, %cst_105 [1] : vector<8x32xf32> to vector<8xf32>
    %179 = vector.shape_cast %178 : vector<8xf32> to vector<8x1xf32>
    %cst_106 = arith.constant 3.200000e+01 : f32
    %180 = vector.broadcast %cst_106 : f32 to vector<8x1xf32>
    %181 = arith.divf %179, %180 : vector<8x1xf32>
    %182 = vector.broadcast %181 : vector<8x1xf32> to vector<8x32xf32>
    %183 = arith.subf %173, %182 : vector<8x32xf32>
    %184 = arith.mulf %183, %183 : vector<8x32xf32>
    %cst_107 = arith.constant dense<0.000000e+00> : vector<8xf32>
    %185 = vector.multi_reduction <add>, %184, %cst_107 [1] : vector<8x32xf32> to vector<8xf32>
    %186 = vector.shape_cast %185 : vector<8xf32> to vector<8x1xf32>
    %cst_108 = arith.constant 3.200000e+01 : f32
    %187 = vector.broadcast %cst_108 : f32 to vector<8x1xf32>
    %188 = arith.divf %186, %187 : vector<8x1xf32>
    %189 = vector.broadcast %181 : vector<8x1xf32> to vector<8x32xf32>
    %190 = arith.subf %173, %189 : vector<8x32xf32>
    %cst_109 = arith.constant 9.99999996E-13 : f32
    %191 = vector.broadcast %cst_109 : f32 to vector<8x1xf32>
    %192 = arith.addf %188, %191 : vector<8x1xf32>
    %193 = math.rsqrt %192 : vector<8x1xf32>
    %194 = vector.broadcast %193 : vector<8x1xf32> to vector<8x32xf32>
    %195 = arith.mulf %190, %194 : vector<8x32xf32>
    %196 = vector.broadcast %175 : vector<1x32xf32> to vector<8x32xf32>
    %197 = arith.mulf %195, %196 : vector<8x32xf32>
    %198 = vector.broadcast %177 : vector<1x32xf32> to vector<8x32xf32>
    %199 = arith.addf %197, %198 : vector<8x32xf32>
    %c1 = arith.constant 1 : index
    %c0_110 = arith.constant 0 : index
    %c0_111 = arith.constant 0 : index
    %200 = vector.load %arg5[%c1, %c0_110, %c0_111] : memref<2x32x96xf32, #tpu.memory_space<vmem>>, vector<1x32x96xf32>
    %201 = vector.shape_cast %200 : vector<1x32x96xf32> to vector<32x96xf32>
    %cst_112 = arith.constant dense<0.000000e+00> : vector<8x96xf32>
    %202 = tpu.matmul %199, %201, %cst_112 {dimension_numbers = #tpu.dot_dimension_numbers<[1], [0], [0], [1], [0, 0, 1, 1], [], []>} : vector<8x32xf32>, vector<32x96xf32>, vector<8x96xf32> -> vector<8x96xf32>
    %c1_113 = arith.constant 1 : index
    %c0_114 = arith.constant 0 : index
    %c0_115 = arith.constant 0 : index
    %203 = vector.load %arg6[%c1_113, %c0_114, %c0_115] : memref<2x1x96xf32, #tpu.memory_space<vmem>>, vector<1x1x96xf32>
    %204 = vector.shape_cast %203 : vector<1x1x96xf32> to vector<1x96xf32>
    %205 = vector.broadcast %204 : vector<1x96xf32> to vector<8x96xf32>
    %206 = arith.addf %202, %205 : vector<8x96xf32>
    %c0_116 = arith.constant 0 : index
    %c0_117 = arith.constant 0 : index
    %207 = vector.load %arg18[%c0_116, %c0_117] : memref<8x96xf32, #tpu.memory_space<vmem>>, vector<8x96xf32>
    tpu.vector_store %arg18[%c0_116, %c0_117], %206 {strides = array<i32>} : memref<8x96xf32, #tpu.memory_space<vmem>>, vector<8x96xf32>,
    %c1_118 = arith.constant 1 : index
    %c0_119 = arith.constant 0 : index
    %c0_120 = arith.constant 0 : index
    %208 = vector.load %arg8[%c1_118, %c0_119, %c0_120] : memref<2x1x32xf32, #tpu.memory_space<vmem>>, vector<1x1x32xf32>
    %209 = vector.shape_cast %208 : vector<1x1x32xf32> to vector<1x32xf32>
    %c0_121 = arith.constant 0 : index
    %c0_122 = arith.constant 0 : index
    %210 = vector.load %arg18[%c0_121, %c0_122] : memref<8x96xf32, #tpu.memory_space<vmem>>, vector<8x8xf32>
    %c0_123 = arith.constant 0 : index
    %c32_124 = arith.constant 32 : index
    %211 = vector.load %arg18[%c0_123, %c32_124] : memref<8x96xf32, #tpu.memory_space<vmem>>, vector<8x8xf32>
    %c0_125 = arith.constant 0 : index
    %c64_126 = arith.constant 64 : index
    %212 = vector.load %arg18[%c0_125, %c64_126] : memref<8x96xf32, #tpu.memory_space<vmem>>, vector<8x8xf32>
    "tpu.trace_start"() <{level = 10 : i32, message = "qd,kd->qk"}> : () -> ()
    %cst_127 = arith.constant dense<0.000000e+00> : vector<8x8xf32>
    %213 = tpu.matmul %210, %211, %cst_127 {dimension_numbers = #tpu.dot_dimension_numbers<[1], [1], [0], [0], [0, 0, 1, 0], [], []>} : vector<8x8xf32>, vector<8x8xf32>, vector<8x8xf32> -> vector<8x8xf32>
    "tpu.trace_stop"() : () -> ()
    %214 = vector.broadcast %3 : vector<1x8xf32> to vector<8x8xf32>
    %215 = arith.addf %213, %214 : vector<8x8xf32>
    %cst_128 = arith.constant dense<0xFF800000> : vector<8xf32>
    %216 = vector.multi_reduction <maximumf>, %215, %cst_128 [1] : vector<8x8xf32> to vector<8xf32>
    %217 = vector.shape_cast %216 : vector<8xf32> to vector<8x1xf32>
    %218 = vector.broadcast %217 : vector<8x1xf32> to vector<8x8xf32>
    %219 = arith.subf %215, %218 : vector<8x8xf32>
    %220 = math.exp %219 : vector<8x8xf32>
    %cst_129 = arith.constant dense<0.000000e+00> : vector<8xf32>
    %221 = vector.multi_reduction <add>, %220, %cst_129 [1] : vector<8x8xf32> to vector<8xf32>
    %222 = vector.shape_cast %221 : vector<8xf32> to vector<8x1xf32>
    %223 = vector.broadcast %222 : vector<8x1xf32> to vector<8x8xf32>
    %224 = arith.divf %220, %223 : vector<8x8xf32>
    %cst_130 = arith.constant dense<0.000000e+00> : vector<8x8xf32>
    %225 = tpu.matmul %224, %212, %cst_130 {dimension_numbers = #tpu.dot_dimension_numbers<[1], [0], [0], [1], [0, 0, 1, 1], [], []>} : vector<8x8xf32>, vector<8x8xf32>, vector<8x8xf32> -> vector<8x8xf32>
    %c1_131 = arith.constant 1 : index
    %c0_132 = arith.constant 0 : index
    %c0_133 = arith.constant 0 : index
    %226 = vector.load %arg7[%c1_131, %c0_132, %c0_133] : memref<2x32x32xf32, #tpu.memory_space<vmem>>, vector<1x8x32xf32>
    %227 = vector.shape_cast %226 : vector<1x8x32xf32> to vector<8x32xf32>
    %cst_134 = arith.constant dense<0.000000e+00> : vector<8x32xf32>
    %228 = tpu.matmul %225, %227, %cst_134 {dimension_numbers = #tpu.dot_dimension_numbers<[1], [0], [0], [1], [0, 0, 1, 1], [], []>} : vector<8x8xf32>, vector<8x32xf32>, vector<8x32xf32> -> vector<8x32xf32>
    %229 = vector.broadcast %209 : vector<1x32xf32> to vector<8x32xf32>
    %230 = arith.addf %229, %228 : vector<8x32xf32>
    %c0_135 = arith.constant 0 : index
    %c8_136 = arith.constant 8 : index
    %231 = vector.load %arg18[%c0_135, %c8_136] : memref<8x96xf32, #tpu.memory_space<vmem>>, vector<8x8xf32>
    %c0_137 = arith.constant 0 : index
    %c40_138 = arith.constant 40 : index
    %232 = vector.load %arg18[%c0_137, %c40_138] : memref<8x96xf32, #tpu.memory_space<vmem>>, vector<8x8xf32>
    %c0_139 = arith.constant 0 : index
    %c72_140 = arith.constant 72 : index
    %233 = vector.load %arg18[%c0_139, %c72_140] : memref<8x96xf32, #tpu.memory_space<vmem>>, vector<8x8xf32>
    "tpu.trace_start"() <{level = 10 : i32, message = "qd,kd->qk"}> : () -> ()
    %cst_141 = arith.constant dense<0.000000e+00> : vector<8x8xf32>
    %234 = tpu.matmul %231, %232, %cst_141 {dimension_numbers = #tpu.dot_dimension_numbers<[1], [1], [0], [0], [0, 0, 1, 0], [], []>} : vector<8x8xf32>, vector<8x8xf32>, vector<8x8xf32> -> vector<8x8xf32>
    "tpu.trace_stop"() : () -> ()
    %235 = vector.broadcast %3 : vector<1x8xf32> to vector<8x8xf32>
    %236 = arith.addf %234, %235 : vector<8x8xf32>
    %cst_142 = arith.constant dense<0xFF800000> : vector<8xf32>
    %237 = vector.multi_reduction <maximumf>, %236, %cst_142 [1] : vector<8x8xf32> to vector<8xf32>
    %238 = vector.shape_cast %237 : vector<8xf32> to vector<8x1xf32>
    %239 = vector.broadcast %238 : vector<8x1xf32> to vector<8x8xf32>
    %240 = arith.subf %236, %239 : vector<8x8xf32>
    %241 = math.exp %240 : vector<8x8xf32>
    %cst_143 = arith.constant dense<0.000000e+00> : vector<8xf32>
    %242 = vector.multi_reduction <add>, %241, %cst_143 [1] : vector<8x8xf32> to vector<8xf32>
    %243 = vector.shape_cast %242 : vector<8xf32> to vector<8x1xf32>
    %244 = vector.broadcast %243 : vector<8x1xf32> to vector<8x8xf32>
    %245 = arith.divf %241, %244 : vector<8x8xf32>
    %cst_144 = arith.constant dense<0.000000e+00> : vector<8x8xf32>
    %246 = tpu.matmul %245, %233, %cst_144 {dimension_numbers = #tpu.dot_dimension_numbers<[1], [0], [0], [1], [0, 0, 1, 1], [], []>} : vector<8x8xf32>, vector<8x8xf32>, vector<8x8xf32> -> vector<8x8xf32>
    %c1_145 = arith.constant 1 : index
    %c8_146 = arith.constant 8 : index
    %c0_147 = arith.constant 0 : index
    %247 = vector.load %arg7[%c1_145, %c8_146, %c0_147] : memref<2x32x32xf32, #tpu.memory_space<vmem>>, vector<1x8x32xf32>
    %248 = vector.shape_cast %247 : vector<1x8x32xf32> to vector<8x32xf32>
    %cst_148 = arith.constant dense<0.000000e+00> : vector<8x32xf32>
    %249 = tpu.matmul %246, %248, %cst_148 {dimension_numbers = #tpu.dot_dimension_numbers<[1], [0], [0], [1], [0, 0, 1, 1], [], []>} : vector<8x8xf32>, vector<8x32xf32>, vector<8x32xf32> -> vector<8x32xf32>
    %250 = arith.addf %230, %249 : vector<8x32xf32>
    %c0_149 = arith.constant 0 : index
    %c16_150 = arith.constant 16 : index
    %251 = vector.load %arg18[%c0_149, %c16_150] : memref<8x96xf32, #tpu.memory_space<vmem>>, vector<8x8xf32>
    %c0_151 = arith.constant 0 : index
    %c48_152 = arith.constant 48 : index
    %252 = vector.load %arg18[%c0_151, %c48_152] : memref<8x96xf32, #tpu.memory_space<vmem>>, vector<8x8xf32>
    %c0_153 = arith.constant 0 : index
    %c80_154 = arith.constant 80 : index
    %253 = vector.load %arg18[%c0_153, %c80_154] : memref<8x96xf32, #tpu.memory_space<vmem>>, vector<8x8xf32>
    "tpu.trace_start"() <{level = 10 : i32, message = "qd,kd->qk"}> : () -> ()
    %cst_155 = arith.constant dense<0.000000e+00> : vector<8x8xf32>
    %254 = tpu.matmul %251, %252, %cst_155 {dimension_numbers = #tpu.dot_dimension_numbers<[1], [1], [0], [0], [0, 0, 1, 0], [], []>} : vector<8x8xf32>, vector<8x8xf32>, vector<8x8xf32> -> vector<8x8xf32>
    "tpu.trace_stop"() : () -> ()
    %255 = vector.broadcast %3 : vector<1x8xf32> to vector<8x8xf32>
    %256 = arith.addf %254, %255 : vector<8x8xf32>
    %cst_156 = arith.constant dense<0xFF800000> : vector<8xf32>
    %257 = vector.multi_reduction <maximumf>, %256, %cst_156 [1] : vector<8x8xf32> to vector<8xf32>
    %258 = vector.shape_cast %257 : vector<8xf32> to vector<8x1xf32>
    %259 = vector.broadcast %258 : vector<8x1xf32> to vector<8x8xf32>
    %260 = arith.subf %256, %259 : vector<8x8xf32>
    %261 = math.exp %260 : vector<8x8xf32>
    %cst_157 = arith.constant dense<0.000000e+00> : vector<8xf32>
    %262 = vector.multi_reduction <add>, %261, %cst_157 [1] : vector<8x8xf32> to vector<8xf32>
    %263 = vector.shape_cast %262 : vector<8xf32> to vector<8x1xf32>
    %264 = vector.broadcast %263 : vector<8x1xf32> to vector<8x8xf32>
    %265 = arith.divf %261, %264 : vector<8x8xf32>
    %cst_158 = arith.constant dense<0.000000e+00> : vector<8x8xf32>
    %266 = tpu.matmul %265, %253, %cst_158 {dimension_numbers = #tpu.dot_dimension_numbers<[1], [0], [0], [1], [0, 0, 1, 1], [], []>} : vector<8x8xf32>, vector<8x8xf32>, vector<8x8xf32> -> vector<8x8xf32>
    %c1_159 = arith.constant 1 : index
    %c16_160 = arith.constant 16 : index
    %c0_161 = arith.constant 0 : index
    %267 = vector.load %arg7[%c1_159, %c16_160, %c0_161] : memref<2x32x32xf32, #tpu.memory_space<vmem>>, vector<1x8x32xf32>
    %268 = vector.shape_cast %267 : vector<1x8x32xf32> to vector<8x32xf32>
    %cst_162 = arith.constant dense<0.000000e+00> : vector<8x32xf32>
    %269 = tpu.matmul %266, %268, %cst_162 {dimension_numbers = #tpu.dot_dimension_numbers<[1], [0], [0], [1], [0, 0, 1, 1], [], []>} : vector<8x8xf32>, vector<8x32xf32>, vector<8x32xf32> -> vector<8x32xf32>
    %270 = arith.addf %250, %269 : vector<8x32xf32>
    %c0_163 = arith.constant 0 : index
    %c24_164 = arith.constant 24 : index
    %271 = vector.load %arg18[%c0_163, %c24_164] : memref<8x96xf32, #tpu.memory_space<vmem>>, vector<8x8xf32>
    %c0_165 = arith.constant 0 : index
    %c56_166 = arith.constant 56 : index
    %272 = vector.load %arg18[%c0_165, %c56_166] : memref<8x96xf32, #tpu.memory_space<vmem>>, vector<8x8xf32>
    %c0_167 = arith.constant 0 : index
    %c88_168 = arith.constant 88 : index
    %273 = vector.load %arg18[%c0_167, %c88_168] : memref<8x96xf32, #tpu.memory_space<vmem>>, vector<8x8xf32>
    "tpu.trace_start"() <{level = 10 : i32, message = "qd,kd->qk"}> : () -> ()
    %cst_169 = arith.constant dense<0.000000e+00> : vector<8x8xf32>
    %274 = tpu.matmul %271, %272, %cst_169 {dimension_numbers = #tpu.dot_dimension_numbers<[1], [1], [0], [0], [0, 0, 1, 0], [], []>} : vector<8x8xf32>, vector<8x8xf32>, vector<8x8xf32> -> vector<8x8xf32>
    "tpu.trace_stop"() : () -> ()
    %275 = vector.broadcast %3 : vector<1x8xf32> to vector<8x8xf32>
    %276 = arith.addf %274, %275 : vector<8x8xf32>
    %cst_170 = arith.constant dense<0xFF800000> : vector<8xf32>
    %277 = vector.multi_reduction <maximumf>, %276, %cst_170 [1] : vector<8x8xf32> to vector<8xf32>
    %278 = vector.shape_cast %277 : vector<8xf32> to vector<8x1xf32>
    %279 = vector.broadcast %278 : vector<8x1xf32> to vector<8x8xf32>
    %280 = arith.subf %276, %279 : vector<8x8xf32>
    %281 = math.exp %280 : vector<8x8xf32>
    %cst_171 = arith.constant dense<0.000000e+00> : vector<8xf32>
    %282 = vector.multi_reduction <add>, %281, %cst_171 [1] : vector<8x8xf32> to vector<8xf32>
    %283 = vector.shape_cast %282 : vector<8xf32> to vector<8x1xf32>
    %284 = vector.broadcast %283 : vector<8x1xf32> to vector<8x8xf32>
    %285 = arith.divf %281, %284 : vector<8x8xf32>
    %cst_172 = arith.constant dense<0.000000e+00> : vector<8x8xf32>
    %286 = tpu.matmul %285, %273, %cst_172 {dimension_numbers = #tpu.dot_dimension_numbers<[1], [0], [0], [1], [0, 0, 1, 1], [], []>} : vector<8x8xf32>, vector<8x8xf32>, vector<8x8xf32> -> vector<8x8xf32>
    %c1_173 = arith.constant 1 : index
    %c24_174 = arith.constant 24 : index
    %c0_175 = arith.constant 0 : index
    %287 = vector.load %arg7[%c1_173, %c24_174, %c0_175] : memref<2x32x32xf32, #tpu.memory_space<vmem>>, vector<1x8x32xf32>
    %288 = vector.shape_cast %287 : vector<1x8x32xf32> to vector<8x32xf32>
    %cst_176 = arith.constant dense<0.000000e+00> : vector<8x32xf32>
    %289 = tpu.matmul %286, %288, %cst_176 {dimension_numbers = #tpu.dot_dimension_numbers<[1], [0], [0], [1], [0, 0, 1, 1], [], []>} : vector<8x8xf32>, vector<8x32xf32>, vector<8x32xf32> -> vector<8x32xf32>
    %290 = arith.addf %270, %289 : vector<8x32xf32>
    %291 = arith.addf %199, %290 : vector<8x32xf32>
    %c1_177 = arith.constant 1 : index
    %c0_178 = arith.constant 0 : index
    %c0_179 = arith.constant 0 : index
    %292 = vector.load %arg9[%c1_177, %c0_178, %c0_179] : memref<2x1x32xf32, #tpu.memory_space<vmem>>, vector<1x1x32xf32>
    %293 = vector.shape_cast %292 : vector<1x1x32xf32> to vector<1x32xf32>
    %c1_180 = arith.constant 1 : index
    %c0_181 = arith.constant 0 : index
    %c0_182 = arith.constant 0 : index
    %294 = vector.load %arg10[%c1_180, %c0_181, %c0_182] : memref<2x1x32xf32, #tpu.memory_space<vmem>>, vector<1x1x32xf32>
    %295 = vector.shape_cast %294 : vector<1x1x32xf32> to vector<1x32xf32>
    %cst_183 = arith.constant dense<0.000000e+00> : vector<8xf32>
    %296 = vector.multi_reduction <add>, %291, %cst_183 [1] : vector<8x32xf32> to vector<8xf32>
    %297 = vector.shape_cast %296 : vector<8xf32> to vector<8x1xf32>
    %cst_184 = arith.constant 3.200000e+01 : f32
    %298 = vector.broadcast %cst_184 : f32 to vector<8x1xf32>
    %299 = arith.divf %297, %298 : vector<8x1xf32>
    %300 = vector.broadcast %299 : vector<8x1xf32> to vector<8x32xf32>
    %301 = arith.subf %291, %300 : vector<8x32xf32>
    %302 = arith.mulf %301, %301 : vector<8x32xf32>
    %cst_185 = arith.constant dense<0.000000e+00> : vector<8xf32>
    %303 = vector.multi_reduction <add>, %302, %cst_185 [1] : vector<8x32xf32> to vector<8xf32>
    %304 = vector.shape_cast %303 : vector<8xf32> to vector<8x1xf32>
    %cst_186 = arith.constant 3.200000e+01 : f32
    %305 = vector.broadcast %cst_186 : f32 to vector<8x1xf32>
    %306 = arith.divf %304, %305 : vector<8x1xf32>
    %307 = vector.broadcast %299 : vector<8x1xf32> to vector<8x32xf32>
    %308 = arith.subf %291, %307 : vector<8x32xf32>
    %cst_187 = arith.constant 9.99999996E-13 : f32
    %309 = vector.broadcast %cst_187 : f32 to vector<8x1xf32>
    %310 = arith.addf %306, %309 : vector<8x1xf32>
    %311 = math.rsqrt %310 : vector<8x1xf32>
    %312 = vector.broadcast %311 : vector<8x1xf32> to vector<8x32xf32>
    %313 = arith.mulf %308, %312 : vector<8x32xf32>
    %314 = vector.broadcast %293 : vector<1x32xf32> to vector<8x32xf32>
    %315 = arith.mulf %313, %314 : vector<8x32xf32>
    %316 = vector.broadcast %295 : vector<1x32xf32> to vector<8x32xf32>
    %317 = arith.addf %315, %316 : vector<8x32xf32>
    %c1_188 = arith.constant 1 : index
    %c0_189 = arith.constant 0 : index
    %c0_190 = arith.constant 0 : index
    %318 = vector.load %arg11[%c1_188, %c0_189, %c0_190] : memref<2x32x64xf32, #tpu.memory_space<vmem>>, vector<1x32x64xf32>
    %319 = vector.shape_cast %318 : vector<1x32x64xf32> to vector<32x64xf32>
    %cst_191 = arith.constant dense<0.000000e+00> : vector<8x64xf32>
    %320 = tpu.matmul %317, %319, %cst_191 {dimension_numbers = #tpu.dot_dimension_numbers<[1], [0], [0], [1], [0, 0, 1, 1], [], []>} : vector<8x32xf32>, vector<32x64xf32>, vector<8x64xf32> -> vector<8x64xf32>
    %c1_192 = arith.constant 1 : index
    %c0_193 = arith.constant 0 : index
    %c0_194 = arith.constant 0 : index
    %321 = vector.load %arg12[%c1_192, %c0_193, %c0_194] : memref<2x1x64xf32, #tpu.memory_space<vmem>>, vector<1x1x64xf32>
    %322 = vector.shape_cast %321 : vector<1x1x64xf32> to vector<1x64xf32>
    %323 = vector.broadcast %322 : vector<1x64xf32> to vector<8x64xf32>
    %324 = arith.addf %320, %323 : vector<8x64xf32>
    %cst_195 = arith.constant 5.000000e-01 : f32
    %325 = vector.broadcast %cst_195 : f32 to vector<8x64xf32>
    %326 = arith.mulf %325, %324 : vector<8x64xf32>
    %cst_196 = arith.constant 4.471500e-02 : f32
    %327 = vector.broadcast %cst_196 : f32 to vector<8x64xf32>
    %328 = arith.mulf %327, %324 : vector<8x64xf32>
    %329 = arith.mulf %328, %324 : vector<8x64xf32>
    %330 = arith.mulf %329, %324 : vector<8x64xf32>
    %331 = arith.addf %324, %330 : vector<8x64xf32>
    %cst_197 = arith.constant 0.797884583 : f32
    %332 = vector.broadcast %cst_197 : f32 to vector<8x64xf32>
    %333 = arith.mulf %332, %331 : vector<8x64xf32>
    %334 = math.tanh %333 : vector<8x64xf32>
    %cst_198 = arith.constant 1.000000e+00 : f32
    %335 = vector.broadcast %cst_198 : f32 to vector<8x64xf32>
    %336 = arith.addf %335, %334 : vector<8x64xf32>
    %337 = arith.mulf %326, %336 : vector<8x64xf32>
    %c1_199 = arith.constant 1 : index
    %c0_200 = arith.constant 0 : index
    %c0_201 = arith.constant 0 : index
    %338 = vector.load %arg13[%c1_199, %c0_200, %c0_201] : memref<2x64x32xf32, #tpu.memory_space<vmem>>, vector<1x64x32xf32>
    %339 = vector.shape_cast %338 : vector<1x64x32xf32> to vector<64x32xf32>
    %cst_202 = arith.constant dense<0.000000e+00> : vector<8x32xf32>
    %340 = tpu.matmul %337, %339, %cst_202 {dimension_numbers = #tpu.dot_dimension_numbers<[1], [0], [0], [1], [0, 0, 1, 1], [], []>} : vector<8x64xf32>, vector<64x32xf32>, vector<8x32xf32> -> vector<8x32xf32>
    %c1_203 = arith.constant 1 : index
    %c0_204 = arith.constant 0 : index
    %c0_205 = arith.constant 0 : index
    %341 = vector.load %arg14[%c1_203, %c0_204, %c0_205] : memref<2x1x32xf32, #tpu.memory_space<vmem>>, vector<1x1x32xf32>
    %342 = vector.shape_cast %341 : vector<1x1x32xf32> to vector<1x32xf32>
    %343 = vector.broadcast %342 : vector<1x32xf32> to vector<8x32xf32>
    %344 = arith.addf %340, %343 : vector<8x32xf32>
    %345 = arith.addf %317, %344 : vector<8x32xf32>
    %c1_206 = arith.constant 1 : index
    %c0_207 = arith.constant 0 : index
    %c0_208 = arith.constant 0 : index
    %346 = vector.load %arg15[%c1_206, %c0_207, %c0_208] : memref<2x1x32xf32, #tpu.memory_space<vmem>>, vector<1x1x32xf32>
    %347 = vector.shape_cast %346 : vector<1x1x32xf32> to vector<1x32xf32>
    %c1_209 = arith.constant 1 : index
    %c0_210 = arith.constant 0 : index
    %c0_211 = arith.constant 0 : index
    %348 = vector.load %arg16[%c1_209, %c0_210, %c0_211] : memref<2x1x32xf32, #tpu.memory_space<vmem>>, vector<1x1x32xf32>
    %349 = vector.shape_cast %348 : vector<1x1x32xf32> to vector<1x32xf32>
    %cst_212 = arith.constant dense<0.000000e+00> : vector<8xf32>
    %350 = vector.multi_reduction <add>, %345, %cst_212 [1] : vector<8x32xf32> to vector<8xf32>
    %351 = vector.shape_cast %350 : vector<8xf32> to vector<8x1xf32>
    %cst_213 = arith.constant 3.200000e+01 : f32
    %352 = vector.broadcast %cst_213 : f32 to vector<8x1xf32>
    %353 = arith.divf %351, %352 : vector<8x1xf32>
    %354 = vector.broadcast %353 : vector<8x1xf32> to vector<8x32xf32>
    %355 = arith.subf %345, %354 : vector<8x32xf32>
    %356 = arith.mulf %355, %355 : vector<8x32xf32>
    %cst_214 = arith.constant dense<0.000000e+00> : vector<8xf32>
    %357 = vector.multi_reduction <add>, %356, %cst_214 [1] : vector<8x32xf32> to vector<8xf32>
    %358 = vector.shape_cast %357 : vector<8xf32> to vector<8x1xf32>
    %cst_215 = arith.constant 3.200000e+01 : f32
    %359 = vector.broadcast %cst_215 : f32 to vector<8x1xf32>
    %360 = arith.divf %358, %359 : vector<8x1xf32>
    %361 = vector.broadcast %353 : vector<8x1xf32> to vector<8x32xf32>
    %362 = arith.subf %345, %361 : vector<8x32xf32>
    %cst_216 = arith.constant 9.99999996E-13 : f32
    %363 = vector.broadcast %cst_216 : f32 to vector<8x1xf32>
    %364 = arith.addf %360, %363 : vector<8x1xf32>
    %365 = math.rsqrt %364 : vector<8x1xf32>
    %366 = vector.broadcast %365 : vector<8x1xf32> to vector<8x32xf32>
    %367 = arith.mulf %362, %366 : vector<8x32xf32>
    %368 = vector.broadcast %347 : vector<1x32xf32> to vector<8x32xf32>
    %369 = arith.mulf %367, %368 : vector<8x32xf32>
    %370 = vector.broadcast %349 : vector<1x32xf32> to vector<8x32xf32>
    %371 = arith.addf %369, %370 : vector<8x32xf32>
    %372 = vector.extract_strided_slice %371 {offsets = [0, 0], sizes = [1, 32], strides = [1, 1]} : vector<8x32xf32> to vector<1x32xf32>
    %c0_217 = arith.constant 0 : index
    %c0_218 = arith.constant 0 : index
    %c0_219 = arith.constant 0 : index
    %373 = vector.load %arg17[%c0_217, %c0_218, %c0_219] : memref<1x1x32xf32, #tpu.memory_space<vmem>>, vector<1x1x32xf32>
    %374 = vector.shape_cast %373 : vector<1x1x32xf32> to vector<1x32xf32>
    %375 = vector.shape_cast %372 : vector<1x32xf32> to vector<1x1x32xf32>
    tpu.vector_store %arg17[%c0_217, %c0_218, %c0_219], %375 {strides = array<i32>} : memref<1x1x32xf32, #tpu.memory_space<vmem>>, vector<1x1x32xf32>,
    return
  }
  func.func @transform_0(%arg0: i32) -> (i32, i32, i32) {
    %c0_i32 = arith.constant 0 : i32
    %c0_i32_0 = arith.constant 0 : i32
    %c0_i32_1 = arith.constant 0 : i32
    return %arg0, %c0_i32, %c0_i32_0 : i32, i32, i32
  }
  func.func @transform_1(%arg0: i32) -> (i32, i32, i32) {
    %c0_i32 = arith.constant 0 : i32
    %c0_i32_0 = arith.constant 0 : i32
    %c0_i32_1 = arith.constant 0 : i32
    return %arg0, %c0_i32, %c0_i32_0 : i32, i32, i32
  }
  func.func @transform_2(%arg0: i32) -> (i32, i32) {
    %c0_i32 = arith.constant 0 : i32
    %c0_i32_0 = arith.constant 0 : i32
    %c0_i32_1 = arith.constant 0 : i32
    return %c0_i32, %c0_i32_0 : i32, i32
  }
  func.func @transform_3(%arg0: i32) -> (i32, i32) {
    %c0_i32 = arith.constant 0 : i32
    %c0_i32_0 = arith.constant 0 : i32
    %c0_i32_1 = arith.constant 0 : i32
    return %c0_i32, %c0_i32_0 : i32, i32
  }
  func.func @transform_4(%arg0: i32) -> (i32, i32, i32) {
    %c0_i32 = arith.constant 0 : i32
    %c0_i32_0 = arith.constant 0 : i32
    %c0_i32_1 = arith.constant 0 : i32
    %c0_i32_2 = arith.constant 0 : i32
    return %c0_i32, %c0_i32_0, %c0_i32_1 : i32, i32, i32
  }
  func.func @transform_5(%arg0: i32) -> (i32, i32, i32) {
    %c0_i32 = arith.constant 0 : i32
    %c0_i32_0 = arith.constant 0 : i32
    %c0_i32_1 = arith.constant 0 : i32
    %c0_i32_2 = arith.constant 0 : i32
    return %c0_i32, %c0_i32_0, %c0_i32_1 : i32, i32, i32
  }
  func.func @transform_6(%arg0: i32) -> (i32, i32, i32) {
    %c0_i32 = arith.constant 0 : i32
    %c0_i32_0 = arith.constant 0 : i32
    %c0_i32_1 = arith.constant 0 : i32
    %c0_i32_2 = arith.constant 0 : i32
    return %c0_i32, %c0_i32_0, %c0_i32_1 : i32, i32, i32
  }
  func.func @transform_7(%arg0: i32) -> (i32, i32, i32) {
    %c0_i32 = arith.constant 0 : i32
    %c0_i32_0 = arith.constant 0 : i32
    %c0_i32_1 = arith.constant 0 : i32
    %c0_i32_2 = arith.constant 0 : i32
    return %c0_i32, %c0_i32_0, %c0_i32_1 : i32, i32, i32
  }
  func.func @transform_8(%arg0: i32) -> (i32, i32, i32) {
    %c0_i32 = arith.constant 0 : i32
    %c0_i32_0 = arith.constant 0 : i32
    %c0_i32_1 = arith.constant 0 : i32
    %c0_i32_2 = arith.constant 0 : i32
    return %c0_i32, %c0_i32_0, %c0_i32_1 : i32, i32, i32
  }
  func.func @transform_9(%arg0: i32) -> (i32, i32, i32) {
    %c0_i32 = arith.constant 0 : i32
    %c0_i32_0 = arith.constant 0 : i32
    %c0_i32_1 = arith.constant 0 : i32
    %c0_i32_2 = arith.constant 0 : i32
    return %c0_i32, %c0_i32_0, %c0_i32_1 : i32, i32, i32
  }
  func.func @transform_10(%arg0: i32) -> (i32, i32, i32) {
    %c0_i32 = arith.constant 0 : i32
    %c0_i32_0 = arith.constant 0 : i32
    %c0_i32_1 = arith.constant 0 : i32
    %c0_i32_2 = arith.constant 0 : i32
    return %c0_i32, %c0_i32_0, %c0_i32_1 : i32, i32, i32
  }
  func.func @transform_11(%arg0: i32) -> (i32, i32, i32) {
    %c0_i32 = arith.constant 0 : i32
    %c0_i32_0 = arith.constant 0 : i32
    %c0_i32_1 = arith.constant 0 : i32
    %c0_i32_2 = arith.constant 0 : i32
    return %c0_i32, %c0_i32_0, %c0_i32_1 : i32, i32, i32
  }
  func.func @transform_12(%arg0: i32) -> (i32, i32, i32) {
    %c0_i32 = arith.constant 0 : i32
    %c0_i32_0 = arith.constant 0 : i32
    %c0_i32_1 = arith.constant 0 : i32
    %c0_i32_2 = arith.constant 0 : i32
    return %c0_i32, %c0_i32_0, %c0_i32_1 : i32, i32, i32
  }
  func.func @transform_13(%arg0: i32) -> (i32, i32, i32) {
    %c0_i32 = arith.constant 0 : i32
    %c0_i32_0 = arith.constant 0 : i32
    %c0_i32_1 = arith.constant 0 : i32
    %c0_i32_2 = arith.constant 0 : i32
    return %c0_i32, %c0_i32_0, %c0_i32_1 : i32, i32, i32
  }
  func.func @transform_14(%arg0: i32) -> (i32, i32, i32) {
    %c0_i32 = arith.constant 0 : i32
    %c0_i32_0 = arith.constant 0 : i32
    %c0_i32_1 = arith.constant 0 : i32
    %c0_i32_2 = arith.constant 0 : i32
    return %c0_i32, %c0_i32_0, %c0_i32_1 : i32, i32, i32
  }
  func.func @transform_15(%arg0: i32) -> (i32, i32, i32) {
    %c0_i32 = arith.constant 0 : i32
    %c0_i32_0 = arith.constant 0 : i32
    %c0_i32_1 = arith.constant 0 : i32
    %c0_i32_2 = arith.constant 0 : i32
    return %c0_i32, %c0_i32_0, %c0_i32_1 : i32, i32, i32
  }
  func.func @transform_16(%arg0: i32) -> (i32, i32, i32) {
    %c0_i32 = arith.constant 0 : i32
    %c0_i32_0 = arith.constant 0 : i32
    %c0_i32_1 = arith.constant 0 : i32
    return %arg0, %c0_i32, %c0_i32_0 : i32, i32, i32
  }
}

</mosaic_0001>

<bundles_post_ra>
// kernel: text_encoder_forward.1
= control target key start
LH: loop header
LB: loop body
LE: loop exit
PB: predicated region body
PF: predicated region fallthrough
CT: control target
= control target key end

     0   :  { %s4419_s0 = inlined_call_operand.vmem [shape: f32[2,8,32], index: 0, kind: input, shape index: {}]   ;;  %s4420_s1 = inlined_call_operand.vmem [shape: f32[2,1,8], index: 1, kind: input, shape index: {}]   ;;  %s4421_s2 = inlined_call_operand.vmem [shape: f32[1,32], index: 2, kind: input, shape index: {}]   ;;  %s4422_s3 = inlined_call_operand.vmem [shape: f32[1,32], index: 3, kind: input, shape index: {}]   ;;  %s4423_s4 = inlined_call_operand.vmem [shape: f32[2,32,96], index: 4, kind: input, shape index: {}]   ;;  %s4424_s5 = inlined_call_operand.vmem [shape: f32[2,1,96], index: 5, kind: input, shape index: {}]   ;;  %s4425_s6 = inlined_call_operand.vmem [shape: f32[2,32,32], index: 6, kind: input, shape index: {}]   ;;  %s4426_s7 = inlined_call_operand.vmem [shape: f32[2,1,32], index: 7, kind: input, shape index: {}]   ;;  %s4427_s8 = inlined_call_operand.vmem [shape: f32[2,1,32], index: 8, kind: input, shape index: {}]   ;;  %s4428_s9 = inlined_call_operand.vmem [shape: f32[2,1,32], index: 9, kind: input, shape index: {}]   ;;  %s4429_s10 = inlined_call_operand.vmem [shape: f32[2,32,64], index: 10, kind: input, shape index: {}]   ;;  %s4430_s11 = inlined_call_operand.vmem [shape: f32[2,1,64], index: 11, kind: input, shape index: {}]   ;;  %s4431_s12 = inlined_call_operand.vmem [shape: f32[2,64,32], index: 12, kind: input, shape index: {}]   ;;  %s4432_s13 = inlined_call_operand.vmem [shape: f32[2,1,32], index: 13, kind: input, shape index: {}]   ;;  %s4433_s14 = inlined_call_operand.vmem [shape: f32[2,1,32], index: 14, kind: input, shape index: {}]   ;;  %s4434_s15 = inlined_call_operand.vmem [shape: f32[2,1,32], index: 15, kind: input, shape index: {}]   ;;  %s4435_s16 = inlined_call_operand.hbm [shape: f32[2,1,32], index: 16, kind: output, shape index: {}]  }
   0x1   :  { %4448 = sst [smem:[#allocation8_spill]] %s4419_s0 }
   0x2   :  { %4449 = sst [smem:[#allocation9_spill]] %s4420_s1 }
   0x3   :  { %4450 = sst [smem:[#allocation10_spill]] %s4421_s2 }
   0x4   :  { %4451 = sst [smem:[#allocation11_spill]] %s4422_s3 }
   0x5   :  { %4452 = sst [smem:[#allocation12_spill]] %s4423_s4 }
   0x6   :  { %21 = vsyncpa [#allocation4], 0 }
   0x7   :  { %23 = vsyncpa [#allocation4 + $0x1], 0  ;;  %s3901_s21 = smov 0   ;;  %s3903_s22 = smov 0  }
   0x8   :  { %s3905_s23 = smov 0   ;;  %s3907_s24 = smov 0  }
   0x9 LB: > { %4453 = sst [smem:[#allocation6_spill]] %s3796_s23  ;;  %s3922_s25 = sadd.s32 4294967295, %s3800_s24   ;;  %s3800_s24 = sphi %s3907_s24, %s4477_s24   ;;  %s3796_s23 = sphi %s3905_s23, %s4474_s23   ;;  %s3792_s22 = sphi %s3903_s22, %s4476_s22   ;;  %s3788_s21 = sphi %s3901_s21, %s4475_s21  }
   0xa   : > { %s3261_s26 = sadd.s32 4294967294, %s3800_s24   ;;  %s3926_s27 = sadd.s32 1, %s3800_s24  }
   0xb   : > { %s382_s28 = sadd.s32 1, %s3796_s23  ;;  %s379_s29 = ssub.s32 %s3800_s24, %s3926_s27 }
   0xc   : > { %p392_p0 = scmp.ne.s32.totalorder %s3796_s23, %s3792_s22  ;;  %p380_p1 = scmp.eq.s32.totalorder %s379_s29, 0 }
   0xd   : > { %p393_p2 = scmp.eq.s32.totalorder %s3922_s25, 1  ;;  %p398_p3 = scmp.ne.s32.totalorder %s3792_s22, %s3788_s21 }
   0xe   : > { %p399_p4 = scmp.eq.s32.totalorder %s3261_s26, 1  ;;  %p3264_p7 = scmp.ge.s32.totalorder %s3800_s24, 1 }
   0xf   : > { %s3937_s30 = scalar_select %p380_p1, %s3796_s23, %s382_s28  }
  0x10   : > { %p3939_p5 = por %p393_p2, %p392_p0  ;;  %p3943_p6 = por %p399_p4, %p398_p3 }
  0x11   : > { %4454 = sst [smem:[#allocation7_spill]] %s3937_s30  ;;  %p472_p8 = scmp.lt.s32.totalorder %s3800_s24, 3 }
  0x13   : > { %p473_p9 = pnand %p3264_p7, %p472_p8 }
  0x14   : > { %p523_p10 = scmp.lt.s32.totalorder (!%p473_p9), %s3922_s25, 1  ;;  %s4457_s28 = sld [smem:[#allocation8_spill]] (!%p473_p9) }
  0x15   : > { %476 = sbr.rel (%p473_p9) target bundleno = 7926 (0x1ef6), region = 84  ;;  %s4458_s4 = sld [smem:[#allocation12_spill]] (!%p473_p9) }
  0x16   : > { %s4459_s2 = sld [smem:[#allocation10_spill]] (!%p473_p9)  ;;  %s4444_s30 = smov (!%p473_p9), 64  }
  0x17   : > { %s4460_s3 = sld [smem:[#allocation11_spill]] (!%p473_p9)  ;;  %s4438_s23 = smov (!%p473_p9), 112  }
  0x18   : > { %s4461_s1 = sld [smem:[#allocation9_spill]] (!%p473_p9)  ;;  %s4439_s20 = smov (!%p473_p9), 48  }
  0x1a   : > { %s3951_s18 = scalar_select %p523_p10, %s3922_s25, 1  ;;  %vm534_vm0 = vcmask 261120   ;;  %v3802_v8 = vmov 0.0   ;;  %vm3803_vm1 = vmmov 0   ;;  %v3268_v21 = vld [vmem:[%s4424_s5] ss:$0 sm:$0xff] }
  0x1b   : > { %v566_v7 = vld [vmem:[%s4458_s4 + $0x18] sm:$0xff]  ;;  %3440 = vmatprep.subr.mxu0 %v3802_v8  ;;  %v565_v9 = vld [vmem:[%s4458_s4 + $0x10] sm:$0xff]  ;;  %3448 = vmatprep.mubr.msk.f32.mxu0 %vm3803_vm1, %v3802_v8  ;;  %v564_v10 = vld [vmem:[%s4458_s4 + $0x8] sm:$0xff]  ;;  %vm647_vm2 = vcmask 785408   ;;  %vm660_vm3 = vcmask 64512   ;;  %vm1767_vm4 = vcmask 523264  }
  0x1c   : > { %s3265_s19 = sshll.u32 %s3951_s18, 3  ;;  %3441 = vmatpush3.msra.mxu0 %v566_v7  ;;  %3456 = vmatprep.subr.mxu1 %v3802_v8  ;;  %v563_v11 = vld [vmem:[%s4458_s4] sm:$0xff]  ;;  %v1070_v58 = vld [vmem:[%s4425_s6 + $0x8] sm:$0xff]  ;;  %vm3182_vm5 = vcmask 253952  }
  0x1d   : > { %s526_s29 = scalar_lea.vmem %s4457_s28, %s3265_s19  ;;  %3442 = vmatprep.subr.mxu0 %v3802_v8  ;;  %3458 = vmatprep.mubr.msk.f32.mxu1 %vm3803_vm1, %v3802_v8  ;;  %v3266_v16 = vld [vmem:[%s4459_s2] ss:$0 sm:$0xff]  ;;  %s4446_s28 = smov 88  }
  0x1e   : > { %v530_v0 = vld [vmem:[%s526_s29] sm:$0xff]  ;;  %3443 = vmatpush3.msra.mxu0 %v565_v9  ;;  %s4447_s29 = smov 96   ;;  %s529_s26 = scalar_lea.vmem %s4461_s1, %s3951_s18 }
  0x1f   : > { %v535_v1 = vsel %vm534_vm0, %v530_v0, 0.0  ;;  %3444 = vmatprep.subr.mxu0 %v3802_v8  ;;  %v3267_v18 = vld [vmem:[%s4460_s3] ss:$0 sm:$0xff]  ;;  %s4445_s18 = smov 120   ;;  %s4440_s19 = smov 56  }
  0x20   : > { %536 = vadd.xlane.f32.xlu0 %v535_v1  ;;  %3445 = vmatpush3.msra.mxu0 %v564_v10  ;;  %v4014_v28 = vld [vmem:[%s529_s26] ss:$0 sm:$0xff]  ;;  %s4437_s26 = smov 80  }
  0x21   : > { %3446 = vmatprep.subr.mxu0 %v3802_v8  ;;  %v822_v43 = vld [vmem:[%s4425_s6] sm:$0xff] }
  0x22   : > { %3447 = vmatpush3.msra.mxu0 %v563_v11 }
  0x23   : > { %3451 = vmatprep.subr.mxu0 %v3802_v8 }
  0xa9   : > { %v537_v2 = vpop.xlane.xlu0 %536 }
  0xaa   : > { %v539_v3 = vmul.f32 0.03125, %v537_v2 }
  0xac   : > { %v540_v4 = vsub.f32 %v530_v0, %v539_v3 }
  0xae   : > { %v541_v5 = vmul.f32 %v540_v4, %v540_v4 }
  0xb0   : > { %v542_v6 = vsel %vm534_vm0, %v541_v5, 0.0 }
  0xb1   : > { %543 = vadd.xlane.f32.xlu0 %v542_v6 }
 0x13a   : > { %v544_v12 = vpop.xlane.xlu0 %543 }
 0x13b   : > { %v545_v13 = vmul.f32 0.03125, %v544_v12 }
 0x13d   : > { %v546_v14 = vadd.f32 1e-12, %v545_v13  ;;  %v3275_v13 = vld [vmem:[%s4426_s7] ss:$0 sm:$0xff] }
 0x13f   : > { %3694 = vrsqrt.f32 %v546_v14 }
 0x14c   : > { %v3695_v15 = vpop.eup %3694 }
 0x14d   : > { %v548_v17 = vmul.f32 %v3695_v15, %v540_v4 }
 0x14f   : > { %v555_v19 = vmul.f32 %v3266_v16, %v548_v17 }
 0x151   : > { %v3987_v20 = vadd.f32 %v3267_v18, %v555_v19 }
 0x153   : > { %3449 = vmatmul.mubr.msk.f32.vlgmr.msra.gmra.mxu0 %vm534_vm0, %v3987_v20 }
 0x154   : > { %3453 = vmatprep.mubr.msk.f32.mxu0 %vm3803_vm1, %v3802_v8 }
 0x213   : > { %v643_v22 = vpop.f32.mrf.mxu0 }
 0x214   : > { %v644_v23 = vadd.f32 %v3268_v21, %v643_v22 }
 0x215   : > { %v3450_v24 = vpop.f32.mrf.mxu0 }
 0x216   : > { %648 = vst.msk [vmem:[#allocation2] sm:$0xff] %vm647_vm2, %v644_v23  ;;  %v1312_v24 = vld [vmem:[%s4425_s6 + $0x10] sm:$0xff] }
 0x21d   : > { %v3997_v25 = vld [vmem:[#allocation2] sm:$0xff] }
 0x21e   : > { %746 = vrot.lane.b32.xlu0 %v3997_v25, %s4444_s30  ;;  %658 = vrot.lane.b32.xlu1 %v3997_v25, %s4447_s29  ;;  %s4464_s30 = smov 120   ;;  %s4466_s29 = smov 56  }
 0x290   : > { %v747_v26 = vpop.permute.xlu0 %746  ;;  %v659_v27 = vpop.permute.xlu1 %658 }
 0x291   : > { %3452 = vmatpush3.xpose.msk.msra.mxu0 %vm660_vm3, %v659_v27  ;;  %3457 = vmatpush3.msra.mxu1 %v747_v26 }
 0x292   : > { %3466 = vmatprep.subr.mxu1 %v3802_v8  ;;  %3461 = vmatprep.subr.mxu0 %v3802_v8 }
 0x294   : > { %3454 = vmatmul.mubr.msk.f32.vlgmr.msra.gmra.mxu0 %vm660_vm3, %v3997_v25 }
 0x295   : > { %3463 = vmatprep.mubr.msk.f32.mxu0 %vm3803_vm1, %v3802_v8  ;;  %3462 = vmatpush3.msra.mxu0 %v822_v43 }
 0x296   : > { %3471 = vmatprep.subr.mxu0 %v3802_v8 }
 0x354   : > { %v731_v29 = vpop.f32.mrf.mxu0 }
 0x355   : > { %v732_v30 = vadd.f32 %v4014_v28, %v731_v29 }
 0x356   : > { %v3455_v31 = vpop.f32.mrf.mxu0 }
 0x357   : > { %v735_v32 = vsel %vm660_vm3, %v732_v30, -inf }
 0x358   : > { %736 = vmax.xlane.f32.xlu1 %v735_v32 }
 0x3e1   : > { %v737_v33 = vpop.xlane.xlu1 %736 }
 0x3e2   : > { %v738_v34 = vsub.f32 %v732_v30, %v737_v33 }
 0x3e4   : > { %v739_v35 = vmul.f32 1.442695, %v738_v34 }
 0x3e6   : > { %3696 = vpow2.f32 %v739_v35 }
 0x3f3   : > { %v3697_v36 = vpop.eup %3696 }
 0x3f4   : > { %v741_v37 = vsel %vm660_vm3, %v3697_v36, 0.0 }
 0x3f5   : > { %742 = vadd.xlane.f32.xlu0 %v741_v37 }
 0x40b   : > { %907 = vrot.lane.b32.xlu0 %v3997_v25, %s4446_s28  ;;  %s4467_s28 = smov 112  }
 0x40f   : > { %905 = vrot.lane.b32.xlu0 %v3997_v25, %s4445_s18  ;;  %s4465_s18 = smov 64  }
 0x47e   : > { %v743_v38 = vpop.xlane.xlu0 %742 }
 0x47f   : > { %3698 = vrcp.f32 %v743_v38 }
 0x482   : > { %v908_v40 = vpop.permute.xlu0 %907 }
 0x486   : > { %v906_v42 = vpop.permute.xlu0 %905 }
 0x48c   : > { %v3699_v39 = vpop.eup %3698 }
 0x48d   : > { %v745_v41 = vmul.f32 %v3699_v39, %v3697_v36  ;;  %v1554_v39 = vld [vmem:[%s4425_s6 + $0x18] sm:$0xff] }
 0x48f   : > { %3459 = vmatmul.mubr.msk.f32.vlgmr.msra.gmra.mxu1 %vm660_vm3, %v745_v41 }
 0x490   : > { %3467 = vmatpush3.xpose.msk.msra.mxu1 %vm660_vm3, %v908_v40  ;;  %3468 = vmatprep.mubr.msk.f32.mxu1 %vm3803_vm1, %v3802_v8 }
 0x491   : > { %3476 = vmatprep.subr.mxu1 %v3802_v8 }
 0x493   : > { %3469 = vmatmul.mubr.msk.f32.vlgmr.msra.gmra.mxu1 %vm660_vm3, %v906_v42 }
 0x494   : > { %3478 = vmatprep.mubr.msk.f32.mxu1 %vm3803_vm1, %v3802_v8  ;;  %3477 = vmatpush3.msra.mxu1 %v1070_v58  ;;  %v1661_v58 = vld [vmem:[%s4429_s10 + $0x10] sm:$0xff] }
 0x495   : > { %3486 = vmatprep.subr.mxu1 %v3802_v8 }
 0x54f   : > { %v818_v44 = vpop.f32.mrf.mxu1 }
 0x550   : > { %3464 = vmatmul.mubr.msk.f32.vlgmr.msra.gmra.mxu0 %vm660_vm3, %v818_v44 }
 0x551   : > { %v3460_v45 = vpop.f32.mrf.mxu1  ;;  %3473 = vmatprep.mubr.msk.f32.mxu0 %vm3803_vm1, %v3802_v8 }
 0x553   : > { %v979_v46 = vpop.f32.mrf.mxu1 }
 0x554   : > { %v980_v47 = vadd.f32 %v4014_v28, %v979_v46 }
 0x555   : > { %v3470_v48 = vpop.f32.mrf.mxu1 }
 0x556   : > { %v983_v49 = vsel %vm660_vm3, %v980_v47, -inf }
 0x557   : > { %984 = vmax.xlane.f32.xlu1 %v983_v49 }
 0x568   : > { %994 = vrot.lane.b32.xlu1 %v3997_v25, %s4440_s19  ;;  %s4443_s19 = smov 104  }
 0x56c   : > { %1149 = vrot.lane.b32.xlu1 %v3997_v25, %s4437_s26  ;;  %s4441_s26 = smov 72  }
 0x570   : > { %1147 = vrot.lane.b32.xlu1 %v3997_v25, %s4438_s23  ;;  %s4463_s23 = smov 88  }
 0x5e0   : > { %v985_v50 = vpop.xlane.xlu1 %984 }
 0x5e1   : > { %v986_v51 = vsub.f32 %v980_v47, %v985_v50 }
 0x5e3   : > { %v987_v52 = vmul.f32 1.442695, %v986_v51 }
 0x5e4   : > { %v995_v53 = vpop.permute.xlu1 %994 }
 0x5e5   : > { %3700 = vpow2.f32 %v987_v52  ;;  %3472 = vmatpush3.msra.mxu0 %v995_v53 }
 0x5e6   : > { %3481 = vmatprep.subr.mxu0 %v3802_v8 }
 0x5e8   : > { %v1150_v61 = vpop.permute.xlu1 %1149 }
 0x5ec   : > { %v1148_v63 = vpop.permute.xlu1 %1147 }
 0x5f2   : > { %v3701_v54 = vpop.eup %3700 }
 0x5f3   : > { %v989_v55 = vsel %vm660_vm3, %v3701_v54, 0.0 }
 0x5f4   : > { %990 = vadd.xlane.f32.xlu0 %v989_v55 }
 0x60a   : > { %1236 = vrot.lane.b32.xlu0 %v3997_v25, %s4439_s20  ;;  %s4462_s20 = smov 96  }
 0x610   : > { %v892_v56 = vpop.f32.mrf.mxu0 }
 0x611   : > { %v902_v14 = vadd.f32 %v3275_v13, %v892_v56  ;;  %v1752_v13 = vld [vmem:[%s4431_s12] sm:$0xff] }
 0x612   : > { %v3465_v57 = vpop.f32.mrf.mxu0 }
 0x613   : > { %v1662_v57 = vld [vmem:[%s4429_s10 + $0x18] sm:$0xff] }
 0x67d   : > { %v991_v59 = vpop.xlane.xlu0 %990 }
 0x67e   : > { %3702 = vrcp.f32 %v991_v59  ;;  %v1659_v59 = vld [vmem:[%s4429_s10] sm:$0xff] }
 0x681   : > { %v1237_v1 = vpop.permute.xlu0 %1236 }
 0x68b   : > { %v3703_v60 = vpop.eup %3702 }
 0x68c   : > { %v993_v62 = vmul.f32 %v3703_v60, %v3701_v54 }
 0x68e   : > { %3474 = vmatmul.mubr.msk.f32.vlgmr.msra.gmra.mxu0 %vm660_vm3, %v993_v62 }
 0x68f   : > { %3482 = vmatpush3.xpose.msk.msra.mxu0 %vm660_vm3, %v1150_v61  ;;  %3483 = vmatprep.mubr.msk.f32.mxu0 %vm3803_vm1, %v3802_v8 }
 0x690   : > { %3491 = vmatprep.subr.mxu0 %v3802_v8 }
 0x692   : > { %3484 = vmatmul.mubr.msk.f32.vlgmr.msra.gmra.mxu0 %vm660_vm3, %v1148_v63 }
 0x693   : > { %3493 = vmatprep.mubr.msk.f32.mxu0 %vm3803_vm1, %v3802_v8  ;;  %3492 = vmatpush3.msra.mxu0 %v1312_v24 }
 0x694   : > { %3501 = vmatprep.subr.mxu0 %v3802_v8 }
 0x74e   : > { %v1066_v0 = vpop.f32.mrf.mxu0 }
 0x74f   : > { %3479 = vmatmul.mubr.msk.f32.vlgmr.msra.gmra.mxu1 %vm660_vm3, %v1066_v0  ;;  %v3288_v0 = vld [vmem:[%s4427_s8] ss:$0 sm:$0xff] }
 0x750   : > { %3487 = vmatpush3.msra.mxu1 %v1237_v1  ;;  %v3475_v2 = vpop.f32.mrf.mxu0  ;;  %3488 = vmatprep.mubr.msk.f32.mxu1 %vm3803_vm1, %v3802_v8 }
 0x751   : > { %3496 = vmatprep.subr.mxu1 %v3802_v8  ;;  %v3289_v2 = vld [vmem:[%s4428_s9] ss:$0 sm:$0xff] }
 0x752   : > { %v1221_v3 = vpop.f32.mrf.mxu0 }
 0x753   : > { %v1222_v4 = vadd.f32 %v4014_v28, %v1221_v3 }
 0x754   : > { %v3485_v5 = vpop.f32.mrf.mxu0 }
 0x755   : > { %v1225_v6 = vsel %vm660_vm3, %v1222_v4, -inf  ;;  %v1759_v5 = vld [vmem:[%s4431_s12 + $0x38] sm:$0xff] }
 0x756   : > { %1226 = vmax.xlane.f32.xlu1 %v1225_v6  ;;  %v1758_v6 = vld [vmem:[%s4431_s12 + $0x30] sm:$0xff] }
 0x7df   : > { %v1227_v7 = vpop.xlane.xlu1 %1226 }
 0x7e0   : > { %v1228_v9 = vsub.f32 %v1222_v4, %v1227_v7  ;;  %v1757_v7 = vld [vmem:[%s4431_s12 + $0x28] sm:$0xff] }
 0x7e2   : > { %v1229_v10 = vmul.f32 1.442695, %v1228_v9  ;;  %v1756_v9 = vld [vmem:[%s4431_s12 + $0x20] sm:$0xff] }
 0x7e4   : > { %3704 = vpow2.f32 %v1229_v10  ;;  %v1755_v10 = vld [vmem:[%s4431_s12 + $0x18] sm:$0xff] }
 0x7f1   : > { %v3705_v11 = vpop.eup %3704 }
 0x7f2   : > { %v1231_v12 = vsel %vm660_vm3, %v3705_v11, 0.0 }
 0x7f3   : > { %1232 = vadd.xlane.f32.xlu0 %v1231_v12  ;;  %v1753_v12 = vld [vmem:[%s4431_s12 + $0x8] sm:$0xff] }
 0x809   : > { %1391 = vrot.lane.b32.xlu0 %v3997_v25, %s4441_s26  ;;  %s4442_s26 = smov 40  }
 0x80d   : > { %1389 = vrot.lane.b32.xlu0 %v3997_v25, %s4443_s19  ;;  %s4470_s19 = smov 104  }
 0x80f   : > { %v1140_v15 = vpop.f32.mrf.mxu1 }
 0x810   : > { %v1144_v16 = vadd.f32 %v1140_v15, %v902_v14  ;;  %v3290_v14 = vld [vmem:[%s4430_s11] ss:$0 sm:$0xff] }
 0x811   : > { %v3480_v17 = vpop.f32.mrf.mxu1 }
 0x87c   : > { %v1233_v18 = vpop.xlane.xlu0 %1232 }
 0x87d   : > { %3706 = vrcp.f32 %v1233_v18 }
 0x880   : > { %v1392_v21 = vpop.permute.xlu0 %1391 }
 0x884   : > { %v1390_v23 = vpop.permute.xlu0 %1389 }
 0x88a   : > { %v3707_v19 = vpop.eup %3706 }
 0x88b   : > { %v1235_v22 = vmul.f32 %v3707_v19, %v3705_v11  ;;  %v1754_v11 = vld [vmem:[%s4431_s12 + $0x10] sm:$0xff] }
 0x88d   : > { %3489 = vmatmul.mubr.msk.f32.vlgmr.msra.gmra.mxu1 %vm660_vm3, %v1235_v22 }
 0x88e   : > { %3497 = vmatpush3.xpose.msk.msra.mxu1 %vm660_vm3, %v1392_v21  ;;  %3498 = vmatprep.mubr.msk.f32.mxu1 %vm3803_vm1, %v3802_v8 }
 0x88f   : > { %3506 = vmatprep.subr.mxu1 %v3802_v8 }
 0x891   : > { %3499 = vmatmul.mubr.msk.f32.vlgmr.msra.gmra.mxu1 %vm660_vm3, %v1390_v23 }
 0x892   : > { %3508 = vmatprep.mubr.msk.f32.mxu1 %vm3803_vm1, %v3802_v8  ;;  %3507 = vmatpush3.msra.mxu1 %v1554_v39 }
 0x893   : > { %3522 = vmatprep.subr.mxu1 %v3802_v8 }
 0x94d   : > { %v1308_v26 = vpop.f32.mrf.mxu1 }
 0x94e   : > { %3494 = vmatmul.mubr.msk.f32.vlgmr.msra.gmra.mxu0 %vm660_vm3, %v1308_v26 }
 0x94f   : > { %v3490_v27 = vpop.f32.mrf.mxu1  ;;  %3503 = vmatprep.mubr.msk.f32.mxu0 %vm3803_vm1, %v3802_v8 }
 0x951   : > { %v1463_v29 = vpop.f32.mrf.mxu1 }
 0x952   : > { %v1464_v30 = vadd.f32 %v4014_v28, %v1463_v29 }
 0x953   : > { %v3500_v31 = vpop.f32.mrf.mxu1 }
 0x954   : > { %v1467_v32 = vsel %vm660_vm3, %v1464_v30, -inf }
 0x955   : > { %1468 = vmax.xlane.f32.xlu1 %v1467_v32 }
 0x966   : > { %1478 = vrot.lane.b32.xlu1 %v3997_v25, %s4442_s26  ;;  %s4471_s26 = smov 72  }
 0x9de   : > { %v1469_v33 = vpop.xlane.xlu1 %1468 }
 0x9df   : > { %v1470_v34 = vsub.f32 %v1464_v30, %v1469_v33  ;;  %v3292_v30 = vld [vmem:[%s4432_s13] ss:$0 sm:$0xff] }
 0x9e1   : > { %v1471_v35 = vmul.f32 1.442695, %v1470_v34 }
 0x9e2   : > { %v1479_v36 = vpop.permute.xlu1 %1478 }
 0x9e3   : > { %3708 = vpow2.f32 %v1471_v35  ;;  %3502 = vmatpush3.msra.mxu0 %v1479_v36 }
 0x9e4   : > { %3511 = vmatprep.subr.mxu0 %v3802_v8 }
 0x9f0   : > { %v3709_v37 = vpop.eup %3708 }
 0x9f1   : > { %v1473_v38 = vsel %vm660_vm3, %v3709_v37, 0.0 }
 0x9f2   : > { %1474 = vadd.xlane.f32.xlu0 %v1473_v38 }
 0xa0e   : > { %v1382_v40 = vpop.f32.mrf.mxu0 }
 0xa0f   : > { %v1386_v25 = vadd.f32 %v1382_v40, %v1144_v16 }
 0xa10   : > { %v3495_v41 = vpop.f32.mrf.mxu0 }
 0xa11   : > { %v3298_v41 = vld [vmem:[%s4458_s4 + $0x30] sm:$0xff] }
 0xa7b   : > { %v1475_v42 = vpop.xlane.xlu0 %1474 }
 0xa7c   : > { %3710 = vrcp.f32 %v1475_v42  ;;  %v3297_v42 = vld [vmem:[%s4458_s4 + $0x28] sm:$0xff] }
 0xa89   : > { %v3711_v43 = vpop.eup %3710 }
 0xa8a   : > { %v1477_v44 = vmul.f32 %v3711_v43, %v3709_v37  ;;  %v3296_v43 = vld [vmem:[%s4458_s4 + $0x20] sm:$0xff] }
 0xa8c   : > { %3504 = vmatmul.mubr.msk.f32.vlgmr.msra.gmra.mxu0 %vm660_vm3, %v1477_v44 }
 0xa8d   : > { %3519 = vmatprep.mubr.msk.f32.mxu0 %vm3803_vm1, %v3802_v8  ;;  %3512 = vmatpush3.msra.mxu0 %v1662_v57 }
 0xa8e   : > { %3513 = vmatprep.subr.mxu0 %v3802_v8 }
 0xa8f   : > { %3514 = vmatpush3.msra.mxu0 %v1661_v58 }
 0xa90   : > { %3515 = vmatprep.subr.mxu0 %v3802_v8 }
 0xb4c   : > { %v1550_v45 = vpop.f32.mrf.mxu0 }
 0xb4d   : > { %3509 = vmatmul.mubr.msk.f32.vlgmr.msra.gmra.mxu1 %vm660_vm3, %v1550_v45 }
 0xb4e   : > { %v3505_v46 = vpop.f32.mrf.mxu0  ;;  %3538 = vmatprep.mubr.msk.f32.mxu1 %vm3803_vm1, %v3802_v8  ;;  %3523 = vmatpush3.msra.mxu1 %v1759_v5 }
 0xb4f   : > { %3524 = vmatprep.subr.mxu1 %v3802_v8 }
 0xb50   : > { %3525 = vmatpush3.msra.mxu1 %v1758_v6 }
 0xb51   : > { %3526 = vmatprep.subr.mxu1 %v3802_v8 }
 0xb52   : > { %3527 = vmatpush3.msra.mxu1 %v1757_v7 }
 0xb53   : > { %3528 = vmatprep.subr.mxu1 %v3802_v8 }
 0xb54   : > { %3529 = vmatpush3.msra.mxu1 %v1756_v9 }
 0xb55   : > { %3530 = vmatprep.subr.mxu1 %v3802_v8 }
 0xb56   : > { %3531 = vmatpush3.msra.mxu1 %v1755_v10  ;;  %v3307_v10 = vld [vmem:[%s4425_s6 + $0x20] sm:$0xff] }
 0xb57   : > { %3532 = vmatprep.subr.mxu1 %v3802_v8 }
 0xb58   : > { %3533 = vmatpush3.msra.mxu1 %v1754_v11 }
 0xb59   : > { %3534 = vmatprep.subr.mxu1 %v3802_v8 }
 0xb5a   : > { %3535 = vmatpush3.msra.mxu1 %v1753_v12 }
 0xb5b   : > { %3536 = vmatprep.subr.mxu1 %v3802_v8 }
 0xb5c   : > { %3537 = vmatpush3.msra.mxu1 %v1752_v13 }
 0xb5d   : > { %3557 = vmatprep.subr.mxu1 %v3802_v8 }
 0xc0d   : > { %v1624_v47 = vpop.f32.mrf.mxu1 }
 0xc0e   : > { %v1628_v48 = vadd.f32 %v1624_v47, %v1386_v25  ;;  %v3299_v25 = vld [vmem:[%s4458_s4 + $0x38] sm:$0xff] }
 0xc0f   : > { %v3510_v49 = vpop.f32.mrf.mxu1 }
 0xc10   : > { %v1629_v50 = vadd.f32 %v1628_v48, %v3987_v20  ;;  %v1660_v20 = vld [vmem:[%s4429_s10 + $0x8] sm:$0xff]  ;;  %v3294_v48 = vld [vmem:[%s4433_s14] ss:$0 sm:$0xff] }
 0xc11   : > { %3516 = vmatpush3.msra.mxu0 %v1660_v20 }
 0xc12   : > { %v1632_v51 = vsel %vm534_vm0, %v1629_v50, 0.0  ;;  %3517 = vmatprep.subr.mxu0 %v3802_v8 }
 0xc13   : > { %1633 = vadd.xlane.f32.xlu1 %v1632_v51  ;;  %3518 = vmatpush3.msra.mxu0 %v1659_v59 }
 0xc14   : > { %3541 = vmatprep.subr.mxu0 %v3802_v8 }
 0xc9c   : > { %v1634_v52 = vpop.xlane.xlu1 %1633 }
 0xc9d   : > { %v1635_v53 = vmul.f32 0.03125, %v1634_v52 }
 0xc9f   : > { %v1636_v54 = vsub.f32 %v1629_v50, %v1635_v53  ;;  %v3295_v50 = vld [vmem:[%s4434_s15] ss:$0 sm:$0xff]  ;;  %v3301_v53 = vld [vmem:[%s4424_s5 + $0x1] ss:$0 sm:$0xff] }
 0xca1   : > { %v1637_v55 = vmul.f32 %v1636_v54, %v1636_v54 }
 0xca3   : > { %v1638_v56 = vsel %vm534_vm0, %v1637_v55, 0.0 }
 0xca4   : > { %1639 = vadd.xlane.f32.xlu0 %v1638_v56 }
 0xd2d   : > { %v1640_v60 = vpop.xlane.xlu0 %1639 }
 0xd2e   : > { %v1641_v61 = vmul.f32 0.03125, %v1640_v60 }
 0xd30   : > { %v1642_v62 = vadd.f32 1e-12, %v1641_v61 }
 0xd32   : > { %3712 = vrsqrt.f32 %v1642_v62 }
 0xd3f   : > { %v3713_v63 = vpop.eup %3712 }
 0xd40   : > { %v1644_v1 = vmul.f32 %v3713_v63, %v1636_v54 }
 0xd42   : > { %v1651_v3 = vmul.f32 %v3288_v0, %v1644_v1 }
 0xd44   : > { %v1658_v4 = vadd.f32 %v3289_v2, %v1651_v3 }
 0xd46   : > { %3520 = vmatmul.mubr.msk.f32.vlgmr.msra.gmra.mxu0 %vm534_vm0, %v1658_v4 }
 0xd47   : > { %3549 = vmatprep.mubr.msk.f32.mxu0 %vm3803_vm1, %v3802_v8  ;;  %3542 = vmatpush3.msra.mxu0 %v3299_v25 }
 0xd48   : > { %3543 = vmatprep.subr.mxu0 %v3802_v8 }
 0xd49   : > { %3544 = vmatpush3.msra.mxu0 %v3298_v41 }
 0xd4a   : > { %3545 = vmatprep.subr.mxu0 %v3802_v8 }
 0xd4b   : > { %3546 = vmatpush3.msra.mxu0 %v3297_v42 }
 0xd4c   : > { %3547 = vmatprep.subr.mxu0 %v3802_v8 }
 0xd4d   : > { %3548 = vmatpush3.msra.mxu0 %v3296_v43 }
 0xd4e   : > { %3552 = vmatprep.subr.mxu0 %v3802_v8 }
 0xe06   : > { %v1739_v15 = vpop.f32.mrf.mxu0 }
 0xe07   : > { %v1740_v16 = vadd.f32 %v3290_v14, %v1739_v15 }
 0xe08   : > { %v3521_v17 = vpop.f32.mrf.mxu0 }
 0xe09   : > { %v1744_v18 = vmul.f32 0.044715, %v1740_v16  ;;  %v1743_v26 = vmul.f32 0.5, %v1740_v16 }
 0xe0b   : > { %v1745_v19 = vmul.f32 %v1744_v18, %v1740_v16 }
 0xe0d   : > { %v1746_v21 = vmul.f32 %v1745_v19, %v1740_v16 }
 0xe0f   : > { %v1747_v22 = vadd.f32 %v1746_v21, %v1740_v16 }
 0xe11   : > { %v1748_v23 = vmul.f32 0.7978846, %v1747_v22 }
 0xe13   : > { %3714 = vtanh.f32 %v1748_v23 }
 0xe20   : > { %v3715_v24 = vpop.eup %3714 }
 0xe21   : > { %v1750_v27 = vadd.f32 1.0, %v3715_v24 }
 0xe23   : > { %v1751_v29 = vmul.f32 %v1750_v27, %v1743_v26 }
 0xe25   : > { %3539 = vmatmul.mubr.msk.f32.vlgmr.msra.gmra.mxu1 %vm1767_vm4, %v1751_v29 }
 0xe26   : > { %3559 = vmatprep.mubr.msk.f32.mxu1 %vm3803_vm1, %v3802_v8 }
 0xee5   : > { %v1837_v31 = vpop.f32.mrf.mxu1 }
 0xee6   : > { %v1838_v32 = vadd.f32 %v3292_v30, %v1837_v31 }
 0xee7   : > { %v3540_v33 = vpop.f32.mrf.mxu1 }
 0xee8   : > { %v1841_v34 = vadd.f32 %v1838_v32, %v1658_v4  ;;  %v3313_v33 = vld [vmem:[%s4425_s6 + $0x28] sm:$0xff] }
 0xeea   : > { %v1844_v35 = vsel %vm534_vm0, %v1841_v34, 0.0 }
 0xeeb   : > { %1845 = vadd.xlane.f32.xlu0 %v1844_v35 }
 0xf74   : > { %v1846_v36 = vpop.xlane.xlu0 %1845 }
 0xf75   : > { %v1847_v37 = vmul.f32 0.03125, %v1846_v36 }
 0xf77   : > { %v1848_v38 = vsub.f32 %v1841_v34, %v1847_v37 }
 0xf79   : > { %v1849_v39 = vmul.f32 %v1848_v38, %v1848_v38 }
 0xf7b   : > { %v1850_v40 = vsel %vm534_vm0, %v1849_v39, 0.0 }
 0xf7c   : > { %1851 = vadd.xlane.f32.xlu0 %v1850_v40 }
0x1005   : > { %v1852_v44 = vpop.xlane.xlu0 %1851 }
0x1006   : > { %v1853_v45 = vmul.f32 0.03125, %v1852_v44 }
0x1008   : > { %v1854_v46 = vadd.f32 1e-12, %v1853_v45  ;;  %v3309_v45 = vld [vmem:[%s4426_s7 + $0x1] ss:$0 sm:$0xff] }
0x100a   : > { %3716 = vrsqrt.f32 %v1854_v46 }
0x1017   : > { %v3717_v47 = vpop.eup %3716 }
0x1018   : > { %v1856_v49 = vmul.f32 %v3717_v47, %v1848_v38 }
0x101a   : > { %v1863_v51 = vmul.f32 %v3294_v48, %v1856_v49 }
0x101c   : > { %v4200_v52 = vadd.f32 %v3295_v50, %v1863_v51 }
0x101e   : > { %3550 = vmatmul.mubr.msk.f32.vlgmr.msra.gmra.mxu0 %vm534_vm0, %v4200_v52 }
0x101f   : > { %3554 = vmatprep.mubr.msk.f32.mxu0 %vm3803_vm1, %v3802_v8 }
0x10de   : > { %v1953_v54 = vpop.f32.mrf.mxu0 }
0x10df   : > { %v1954_v55 = vadd.f32 %v3301_v53, %v1953_v54 }
0x10e0   : > { %v3551_v56 = vpop.f32.mrf.mxu0 }
0x10e1   : > { %1957 = vst.msk [vmem:[#allocation2] sm:$0xff] %vm647_vm2, %v1954_v55  ;;  %v3318_v56 = vld [vmem:[%s4425_s6 + $0x30] sm:$0xff] }
0x10e8   : > { %v4210_v57 = vld [vmem:[#allocation2] sm:$0xff] }
0x10e9   : > { %1962 = vrot.lane.b32.xlu0 %v4210_v57, %s4462_s20  ;;  %s4468_s20 = smov 80  }
0x10ed   : > { %2211 = vrot.lane.b32.xlu0 %v4210_v57, %s4463_s23 }
0x10f1   : > { %2209 = vrot.lane.b32.xlu0 %v4210_v57, %s4464_s30  ;;  %s4472_s30 = smov 40  }
0x115b   : > { %v1963_v58 = vpop.permute.xlu0 %1962 }
0x115c   : > { %3553 = vmatpush3.xpose.msk.msra.mxu0 %vm660_vm3, %v1963_v58 }
0x115d   : > { %3562 = vmatprep.subr.mxu0 %v3802_v8 }
0x115f   : > { %3555 = vmatmul.mubr.msk.f32.vlgmr.msra.gmra.mxu0 %vm660_vm3, %v4210_v57  ;;  %v2212_v6 = vpop.permute.xlu0 %2211 }
0x1160   : > { %3564 = vmatprep.mubr.msk.f32.mxu0 %vm3803_vm1, %v3802_v8  ;;  %3563 = vmatpush3.msra.mxu0 %v3307_v10 }
0x1161   : > { %3572 = vmatprep.subr.mxu0 %v3802_v8 }
0x1163   : > { %v2210_v9 = vpop.permute.xlu0 %2209 }
0x121f   : > { %v2034_v20 = vpop.f32.mrf.mxu0 }
0x1220   : > { %v2035_v59 = vadd.f32 %v4014_v28, %v2034_v20 }
0x1221   : > { %v3556_v60 = vpop.f32.mrf.mxu0 }
0x1222   : > { %v2038_v61 = vsel %vm660_vm3, %v2035_v59, -inf }
0x1223   : > { %2039 = vmax.xlane.f32.xlu1 %v2038_v61 }
0x12ac   : > { %v2040_v62 = vpop.xlane.xlu1 %2039 }
0x12ad   : > { %v2041_v63 = vsub.f32 %v2035_v59, %v2040_v62 }
0x12af   : > { %v2042_v0 = vmul.f32 1.442695, %v2041_v63 }
0x12b1   : > { %3718 = vpow2.f32 %v2042_v0 }
0x12be   : > { %v3719_v1 = vpop.eup %3718 }
0x12bf   : > { %v2044_v2 = vsel %vm660_vm3, %v3719_v1, 0.0 }
0x12c0   : > { %2045 = vadd.xlane.f32.xlu1 %v2044_v2 }
0x12d1   : > { %2049 = vrot.lane.b32.xlu1 %v4210_v57, %s4465_s18  ;;  %s4469_s18 = smov 48  }
0x1349   : > { %v2046_v3 = vpop.xlane.xlu1 %2045 }
0x134a   : > { %3720 = vrcp.f32 %v2046_v3 }
0x134d   : > { %v2050_v4 = vpop.permute.xlu1 %2049 }
0x134e   : > { %3558 = vmatpush3.msra.mxu1 %v2050_v4  ;;  %v3323_v4 = vld [vmem:[%s4425_s6 + $0x38] sm:$0xff] }
0x134f   : > { %3567 = vmatprep.subr.mxu1 %v3802_v8 }
0x1357   : > { %v3721_v5 = vpop.eup %3720 }
0x1358   : > { %v2048_v7 = vmul.f32 %v3721_v5, %v3719_v1 }
0x135a   : > { %3560 = vmatmul.mubr.msk.f32.vlgmr.msra.gmra.mxu1 %vm660_vm3, %v2048_v7 }
0x135b   : > { %3568 = vmatpush3.xpose.msk.msra.mxu1 %vm660_vm3, %v2212_v6  ;;  %3569 = vmatprep.mubr.msk.f32.mxu1 %vm3803_vm1, %v3802_v8 }
0x135c   : > { %3577 = vmatprep.subr.mxu1 %v3802_v8 }
0x135e   : > { %3570 = vmatmul.mubr.msk.f32.vlgmr.msra.gmra.mxu1 %vm660_vm3, %v2210_v9 }
0x135f   : > { %3579 = vmatprep.mubr.msk.f32.mxu1 %vm3803_vm1, %v3802_v8  ;;  %3578 = vmatpush3.msra.mxu1 %v3313_v33  ;;  %v3327_v33 = vld [vmem:[%s4427_s8 + $0x1] ss:$0 sm:$0xff] }
0x1360   : > { %3587 = vmatprep.subr.mxu1 %v3802_v8 }
0x141a   : > { %v2121_v11 = vpop.f32.mrf.mxu1 }
0x141b   : > { %3565 = vmatmul.mubr.msk.f32.vlgmr.msra.gmra.mxu0 %vm660_vm3, %v2121_v11 }
0x141c   : > { %v3561_v12 = vpop.f32.mrf.mxu1  ;;  %3574 = vmatprep.mubr.msk.f32.mxu0 %vm3803_vm1, %v3802_v8 }
0x141e   : > { %v2283_v13 = vpop.f32.mrf.mxu1 }
0x141f   : > { %v2284_v14 = vadd.f32 %v4014_v28, %v2283_v13 }
0x1420   : > { %v3571_v15 = vpop.f32.mrf.mxu1 }
0x1421   : > { %v2287_v16 = vsel %vm660_vm3, %v2284_v14, -inf }
0x1422   : > { %2288 = vmax.xlane.f32.xlu0 %v2287_v16 }
0x1438   : > { %2298 = vrot.lane.b32.xlu0 %v4210_v57, %s4466_s29 }
0x143c   : > { %2451 = vrot.lane.b32.xlu0 %v4210_v57, %s4467_s28 }
0x14ab   : > { %v2289_v17 = vpop.xlane.xlu0 %2288 }
0x14ac   : > { %v2290_v18 = vsub.f32 %v2284_v14, %v2289_v17 }
0x14ae   : > { %v2291_v19 = vmul.f32 1.442695, %v2290_v18 }
0x14af   : > { %v2299_v21 = vpop.permute.xlu0 %2298 }
0x14b0   : > { %3722 = vpow2.f32 %v2291_v19  ;;  %3573 = vmatpush3.msra.mxu0 %v2299_v21 }
0x14b1   : > { %3582 = vmatprep.subr.mxu0 %v3802_v8 }
0x14b3   : > { %v2452_v32 = vpop.permute.xlu0 %2451 }
0x14bd   : > { %v3723_v22 = vpop.eup %3722 }
0x14be   : > { %v2293_v23 = vsel %vm660_vm3, %v3723_v22, 0.0 }
0x14bf   : > { %2294 = vadd.xlane.f32.xlu1 %v2293_v23 }
0x14d0   : > { %2453 = vrot.lane.b32.xlu1 %v4210_v57, %s4468_s20  ;;  %s3815_s20 = smov [#allocation3]  }
0x14d1   : > { %s3744_s23 = sshll.u32 %s3815_s20, 4  ;;  %s3745_s23 = int_to_ptr.vmem [resolvable:$false] %s3744_s23 }
0x14db   : > { %v2196_v24 = vpop.f32.mrf.mxu0 }
0x14dc   : > { %v2206_v46 = vadd.f32 %v3309_v45, %v2196_v24  ;;  %v3332_v24 = vld [vmem:[%s4429_s10 + $0x38] sm:$0xff]  ;;  %v3334_v45 = vld [vmem:[%s4430_s11 + $0x1] ss:$0 sm:$0xff] }
0x14dd   : > { %v3566_v26 = vpop.f32.mrf.mxu0 }
0x14de   : > { %v3331_v26 = vld [vmem:[%s4429_s10 + $0x30] sm:$0xff] }
0x1548   : > { %v2295_v27 = vpop.xlane.xlu1 %2294 }
0x1549   : > { %3724 = vrcp.f32 %v2295_v27  ;;  %v3329_v27 = vld [vmem:[%s4429_s10 + $0x20] sm:$0xff] }
0x154c   : > { %v2454_v31 = vpop.permute.xlu1 %2453 }
0x1556   : > { %v3725_v29 = vpop.eup %3724 }
0x1557   : > { %v2297_v30 = vmul.f32 %v3725_v29, %v3723_v22 }
0x1559   : > { %3575 = vmatmul.mubr.msk.f32.vlgmr.msra.gmra.mxu0 %vm660_vm3, %v2297_v30 }
0x155a   : > { %3583 = vmatpush3.xpose.msk.msra.mxu0 %vm660_vm3, %v2454_v31  ;;  %3584 = vmatprep.mubr.msk.f32.mxu0 %vm3803_vm1, %v3802_v8 }
0x155b   : > { %3592 = vmatprep.subr.mxu0 %v3802_v8 }
0x155d   : > { %3585 = vmatmul.mubr.msk.f32.vlgmr.msra.gmra.mxu0 %vm660_vm3, %v2452_v32 }
0x155e   : > { %3594 = vmatprep.mubr.msk.f32.mxu0 %vm3803_vm1, %v3802_v8  ;;  %3593 = vmatpush3.msra.mxu0 %v3318_v56 }
0x155f   : > { %3602 = vmatprep.subr.mxu0 %v3802_v8 }
0x1619   : > { %v2370_v34 = vpop.f32.mrf.mxu0 }
0x161a   : > { %3580 = vmatmul.mubr.msk.f32.vlgmr.msra.gmra.mxu1 %vm660_vm3, %v2370_v34 }
0x161b   : > { %v3576_v35 = vpop.f32.mrf.mxu0  ;;  %3589 = vmatprep.mubr.msk.f32.mxu1 %vm3803_vm1, %v3802_v8 }
0x161c   : > { %v3328_v35 = vld [vmem:[%s4428_s9 + $0x1] ss:$0 sm:$0xff] }
0x161d   : > { %v2525_v36 = vpop.f32.mrf.mxu0 }
0x161e   : > { %v2526_v37 = vadd.f32 %v4014_v28, %v2525_v36 }
0x161f   : > { %v3586_v38 = vpop.f32.mrf.mxu0 }
0x1620   : > { %v2529_v39 = vsel %vm660_vm3, %v2526_v37, -inf  ;;  %v3343_v38 = vld [vmem:[%s4431_s12 + $0x78] sm:$0xff] }
0x1621   : > { %2530 = vmax.xlane.f32.xlu0 %v2529_v39  ;;  %v3342_v39 = vld [vmem:[%s4431_s12 + $0x70] sm:$0xff] }
0x1637   : > { %2540 = vrot.lane.b32.xlu0 %v4210_v57, %s4469_s18 }
0x163b   : > { %2693 = vrot.lane.b32.xlu0 %v4210_v57, %s4470_s19 }
0x16aa   : > { %v2531_v40 = vpop.xlane.xlu0 %2530 }
0x16ab   : > { %v2532_v25 = vsub.f32 %v2526_v37, %v2531_v40  ;;  %v3341_v40 = vld [vmem:[%s4431_s12 + $0x68] sm:$0xff] }
0x16ad   : > { %v2533_v41 = vmul.f32 1.442695, %v2532_v25  ;;  %v3340_v25 = vld [vmem:[%s4431_s12 + $0x60] sm:$0xff] }
0x16ae   : > { %v2541_v42 = vpop.permute.xlu0 %2540 }
0x16af   : > { %3726 = vpow2.f32 %v2533_v41  ;;  %3588 = vmatpush3.msra.mxu1 %v2541_v42  ;;  %v3339_v41 = vld [vmem:[%s4431_s12 + $0x58] sm:$0xff]  ;;  %v3338_v42 = vld [vmem:[%s4431_s12 + $0x50] sm:$0xff] }
0x16b0   : > { %3597 = vmatprep.subr.mxu1 %v3802_v8 }
0x16b2   : > { %v2694_v55 = vpop.permute.xlu0 %2693 }
0x16bc   : > { %v3727_v43 = vpop.eup %3726 }
0x16bd   : > { %v2535_v44 = vsel %vm660_vm3, %v3727_v43, 0.0 }
0x16be   : > { %2536 = vadd.xlane.f32.xlu1 %v2535_v44  ;;  %v3336_v44 = vld [vmem:[%s4431_s12 + $0x40] sm:$0xff] }
0x16cf   : > { %2695 = vrot.lane.b32.xlu1 %v4210_v57, %s4471_s26  ;;  %s521_s26 = sand.u32 1, %s3792_s22  }
0x16d0   : > { %s522_s18 = scalar_lea.vmem [#allocation3], %s521_s26  ;;  %s3185_s29 = scalar_lea.sflag [#allocation4], %s521_s26 }
0x16d1   : > { %s3197_s19 = sshll.u32 %s522_s18, 4  ;;  %s3198_s19 = int_to_ptr.vmem [resolvable:$true] %s3197_s19 }
0x16d2   : > { %s3740_s28 = scalar_lea.vmem %s3198_s19, 16  ;;  %p3747_p0 = scmp.lt.s32.totalorder %s3198_s19, %s3745_s23 }
0x16d3   : > { %p3741_p11 = scmp.ne.s32.totalorder %s3198_s19, %s3740_s28 }
0x16d5   : > { %p3742_p12 = pnand %p3741_p11, %p3939_p5 }
0x16d7   : > { %p3743_p13 = pneg %p3742_p12 }
0x16da   : > { %v2444_v47 = vpop.f32.mrf.mxu1 }
0x16db   : > { %v2448_v48 = vadd.f32 %v2444_v47, %v2206_v46 }
0x16dc   : > { %v3581_v49 = vpop.f32.mrf.mxu1 }
0x1747   : > { %v2537_v50 = vpop.xlane.xlu1 %2536 }
0x1748   : > { %3728 = vrcp.f32 %v2537_v50 }
0x174b   : > { %v2696_v54 = vpop.permute.xlu1 %2695 }
0x1755   : > { %v3729_v51 = vpop.eup %3728 }
0x1756   : > { %v2539_v53 = vmul.f32 %v3729_v51, %v3727_v43  ;;  %v3337_v43 = vld [vmem:[%s4431_s12 + $0x48] sm:$0xff] }
0x1758   : > { %3590 = vmatmul.mubr.msk.f32.vlgmr.msra.gmra.mxu1 %vm660_vm3, %v2539_v53 }
0x1759   : > { %3598 = vmatpush3.xpose.msk.msra.mxu1 %vm660_vm3, %v2696_v54  ;;  %3599 = vmatprep.mubr.msk.f32.mxu1 %vm3803_vm1, %v3802_v8 }
0x175a   : > { %3607 = vmatprep.subr.mxu1 %v3802_v8 }
0x175c   : > { %3600 = vmatmul.mubr.msk.f32.vlgmr.msra.gmra.mxu1 %vm660_vm3, %v2694_v55 }
0x175d   : > { %3609 = vmatprep.mubr.msk.f32.mxu1 %vm3803_vm1, %v3802_v8  ;;  %3608 = vmatpush3.msra.mxu1 %v3323_v4 }
0x175e   : > { %3623 = vmatprep.subr.mxu1 %v3802_v8 }
0x1818   : > { %v2612_v58 = vpop.f32.mrf.mxu1 }
0x1819   : > { %3595 = vmatmul.mubr.msk.f32.vlgmr.msra.gmra.mxu0 %vm660_vm3, %v2612_v58 }
0x181a   : > { %v3591_v20 = vpop.f32.mrf.mxu1  ;;  %3604 = vmatprep.mubr.msk.f32.mxu0 %vm3803_vm1, %v3802_v8 }
0x181c   : > { %v2767_v59 = vpop.f32.mrf.mxu1 }
0x181d   : > { %v2768_v60 = vadd.f32 %v4014_v28, %v2767_v59 }
0x181e   : > { %v3601_v61 = vpop.f32.mrf.mxu1 }
0x181f   : > { %v2771_v62 = vsel %vm660_vm3, %v2768_v60, -inf }
0x1820   : > { %2772 = vmax.xlane.f32.xlu1 %v2771_v62 }
0x18a9   : > { %v2773_v63 = vpop.xlane.xlu1 %2772 }
0x18aa   : > { %v2774_v0 = vsub.f32 %v2768_v60, %v2773_v63 }
0x18ac   : > { %v2775_v1 = vmul.f32 1.442695, %v2774_v0 }
0x18ae   : > { %3730 = vpow2.f32 %v2775_v1 }
0x18bb   : > { %v3731_v2 = vpop.eup %3730 }
0x18bc   : > { %v2777_v3 = vsel %vm660_vm3, %v3731_v2, 0.0 }
0x18bd   : > { %2778 = vadd.xlane.f32.xlu0 %v2777_v3 }
0x18d3   : > { %2782 = vrot.lane.b32.xlu0 %v4210_v57, %s4472_s30  ;;  %s3351_s30 = sshll.u32 %s3922_s25, 4  ;;  %s3746_s25 = scalar_lea.vmem %s3745_s23, 32 }
0x18d4   : > { %s3195_s3 = scalar_lea.hbm %s4435_s16, %s3351_s30  ;;  %p3748_p1 = scmp.lt.s32.totalorder %s3746_s25, %s3740_s28 }
0x18d6   : > { %p3749_p2 = por %p3748_p1, %p3747_p0 }
0x18d8   : > { %p3750_p3 = pnand %p3749_p2, %p3743_p13 }
0x18d9   : > { %v2686_v28 = vpop.f32.mrf.mxu0 }
0x18da   : > { %v2690_v5 = vadd.f32 %v2686_v28, %v2448_v48 }
0x18db   : > { %v3596_v6 = vpop.f32.mrf.mxu0 }
0x1946   : > { %v2779_v7 = vpop.xlane.xlu0 %2778 }
0x1947   : > { %3732 = vrcp.f32 %v2779_v7 }
0x194a   : > { %v2783_v9 = vpop.permute.xlu0 %2782 }
0x194b   : > { %3603 = vmatpush3.msra.mxu0 %v2783_v9  ;;  %v3349_v9 = vld [vmem:[%s4433_s14 + $0x1] ss:$0 sm:$0xff] }
0x194c   : > { %3612 = vmatprep.subr.mxu0 %v3802_v8 }
0x1954   : > { %v3733_v10 = vpop.eup %3732 }
0x1955   : > { %v2781_v11 = vmul.f32 %v3733_v10, %v3731_v2 }
0x1957   : > { %3605 = vmatmul.mubr.msk.f32.vlgmr.msra.gmra.mxu0 %vm660_vm3, %v2781_v11  ;;  %v3350_v11 = vld [vmem:[%s4434_s15 + $0x1] ss:$0 sm:$0xff] }
0x1958   : > { %3620 = vmatprep.mubr.msk.f32.mxu0 %vm3803_vm1, %v3802_v8  ;;  %3613 = vmatpush3.msra.mxu0 %v3332_v24 }
0x1959   : > { %3614 = vmatprep.subr.mxu0 %v3802_v8 }
0x195a   : > { %3615 = vmatpush3.msra.mxu0 %v3331_v26 }
0x195b   : > { %3616 = vmatprep.subr.mxu0 %v3802_v8 }
0x1a17   : > { %v2854_v57 = vpop.f32.mrf.mxu0 }
0x1a18   : > { %3610 = vmatmul.mubr.msk.f32.vlgmr.msra.gmra.mxu1 %vm660_vm3, %v2854_v57 }
0x1a19   : > { %v3606_v12 = vpop.f32.mrf.mxu0  ;;  %3639 = vmatprep.mubr.msk.f32.mxu1 %vm3803_vm1, %v3802_v8  ;;  %3624 = vmatpush3.msra.mxu1 %v3343_v38 }
0x1a1a   : > { %3625 = vmatprep.subr.mxu1 %v3802_v8 }
0x1a1b   : > { %3626 = vmatpush3.msra.mxu1 %v3342_v39 }
0x1a1c   : > { %3627 = vmatprep.subr.mxu1 %v3802_v8 }
0x1a1d   : > { %3628 = vmatpush3.msra.mxu1 %v3341_v40 }
0x1a1e   : > { %3629 = vmatprep.subr.mxu1 %v3802_v8 }
0x1a1f   : > { %3630 = vmatpush3.msra.mxu1 %v3340_v25 }
0x1a20   : > { %3631 = vmatprep.subr.mxu1 %v3802_v8 }
0x1a21   : > { %3632 = vmatpush3.msra.mxu1 %v3339_v41 }
0x1a22   : > { %3633 = vmatprep.subr.mxu1 %v3802_v8 }
0x1a23   : > { %3634 = vmatpush3.msra.mxu1 %v3338_v42 }
0x1a24   : > { %3635 = vmatprep.subr.mxu1 %v3802_v8 }
0x1a25   : > { %3636 = vmatpush3.msra.mxu1 %v3337_v43 }
0x1a26   : > { %3637 = vmatprep.subr.mxu1 %v3802_v8 }
0x1a27   : > { %3638 = vmatpush3.msra.mxu1 %v3336_v44 }
0x1ad8   : > { %v2928_v13 = vpop.f32.mrf.mxu1 }
0x1ad9   : > { %v2932_v14 = vadd.f32 %v2928_v13, %v2690_v5 }
0x1ada   : > { %v3611_v15 = vpop.f32.mrf.mxu1 }
0x1adb   : > { %v2933_v16 = vadd.f32 %v2932_v14, %v4200_v52  ;;  %v3330_v52 = vld [vmem:[%s4429_s10 + $0x28] sm:$0xff] }
0x1adc   : > { %3617 = vmatpush3.msra.mxu0 %v3330_v52 }
0x1add   : > { %v2938_v17 = vsel %vm534_vm0, %v2933_v16, 0.0  ;;  %3618 = vmatprep.subr.mxu0 %v3802_v8  ;;  %v3345_v8 = vld [vmem:[%s4432_s13 + $0x1] ss:$0 sm:$0xff] }
0x1ade   : > { %2939 = vadd.xlane.f32.xlu1 %v2938_v17  ;;  %3619 = vmatpush3.msra.mxu0 %v3329_v27 }
0x1b67   : > { %v2940_v18 = vpop.xlane.xlu1 %2939 }
0x1b68   : > { %v2941_v19 = vmul.f32 0.03125, %v2940_v18 }
0x1b6a   : > { %v2942_v21 = vsub.f32 %v2933_v16, %v2941_v19 }
0x1b6c   : > { %v2943_v22 = vmul.f32 %v2942_v21, %v2942_v21 }
0x1b6e   : > { %v2944_v23 = vsel %vm534_vm0, %v2943_v22, 0.0 }
0x1b6f   : > { %2945 = vadd.xlane.f32.xlu1 %v2944_v23 }
0x1bf8   : > { %v2946_v29 = vpop.xlane.xlu1 %2945 }
0x1bf9   : > { %v2947_v30 = vmul.f32 0.03125, %v2946_v29 }
0x1bfb   : > { %v2948_v31 = vadd.f32 1e-12, %v2947_v30 }
0x1bfd   : > { %3734 = vrsqrt.f32 %v2948_v31 }
0x1c0a   : > { %v3735_v32 = vpop.eup %3734 }
0x1c0b   : > { %v2950_v34 = vmul.f32 %v3735_v32, %v2942_v21 }
0x1c0d   : > { %v2957_v36 = vmul.f32 %v3327_v33, %v2950_v34 }
0x1c0f   : > { %v2964_v37 = vadd.f32 %v3328_v35, %v2957_v36 }
0x1c11   : > { %3621 = vmatmul.mubr.msk.f32.vlgmr.msra.gmra.mxu0 %vm534_vm0, %v2964_v37 }
0x1cd1   : > { %v3047_v46 = vpop.f32.mrf.mxu0 }
0x1cd2   : > { %v3048_v47 = vadd.f32 %v3334_v45, %v3047_v46 }
0x1cd3   : > { %v3622_v48 = vpop.f32.mrf.mxu0 }
0x1cd4   : > { %v3052_v49 = vmul.f32 0.044715, %v3048_v47  ;;  %v3051_v56 = vmul.f32 0.5, %v3048_v47 }
0x1cd6   : > { %v3053_v50 = vmul.f32 %v3052_v49, %v3048_v47 }
0x1cd8   : > { %v3054_v51 = vmul.f32 %v3053_v50, %v3048_v47 }
0x1cda   : > { %v3055_v53 = vadd.f32 %v3054_v51, %v3048_v47 }
0x1cdc   : > { %v3056_v54 = vmul.f32 0.7978846, %v3055_v53 }
0x1cde   : > { %3736 = vtanh.f32 %v3056_v54 }
0x1ceb   : > { %v3737_v55 = vpop.eup %3736 }
0x1cec   : > { %v3058_v58 = vadd.f32 1.0, %v3737_v55 }
0x1cee   : > { %v3059_v20 = vmul.f32 %v3058_v58, %v3051_v56 }
0x1cf0   : > { %3640 = vmatmul.mubr.msk.f32.vlgmr.msra.gmra.mxu1 %vm1767_vm4, %v3059_v20 }
0x1db0   : > { %v3146_v59 = vpop.f32.mrf.mxu1 }
0x1db1   : > { %v3147_v60 = vadd.f32 %v3345_v8, %v3146_v59 }
0x1db2   : > { %v3641_v61 = vpop.f32.mrf.mxu1 }
0x1db3   : > { %v3150_v62 = vadd.f32 %v3147_v60, %v2964_v37 }
0x1db5   : > { %v3155_v63 = vsel %vm534_vm0, %v3150_v62, 0.0 }
0x1db6   : > { %3156 = vadd.xlane.f32.xlu1 %v3155_v63 }
0x1e3f   : > { %v3157_v0 = vpop.xlane.xlu1 %3156 }
0x1e40   : > { %v3158_v1 = vmul.f32 0.03125, %v3157_v0 }
0x1e42   : > { %v3159_v2 = vsub.f32 %v3150_v62, %v3158_v1 }
0x1e44   : > { %v3160_v3 = vmul.f32 %v3159_v2, %v3159_v2 }
0x1e46   : > { %v3161_v4 = vsel %vm534_vm0, %v3160_v3, 0.0 }
0x1e47   : > { %3162 = vadd.xlane.f32.xlu1 %v3161_v4 }
0x1ed0   : > { %v3163_v28 = vpop.xlane.xlu1 %3162 }
0x1ed1   : > { %v3164_v5 = vmul.f32 0.03125, %v3163_v28 }
0x1ed3   : > { %v3165_v6 = vadd.f32 1e-12, %v3164_v5 }
0x1ed5   : > { %3738 = vrsqrt.f32 %v3165_v6 }
0x1ee2   : > { %v3739_v7 = vpop.eup %3738 }
0x1ee3   : > { %v3167_v10 = vmul.f32 %v3739_v7, %v3159_v2 }
0x1ee5   : > { %v3174_v57 = vmul.f32 %v3349_v9, %v3167_v10 }
0x1ee7   : > { %v3181_v12 = vadd.f32 %v3350_v11, %v3174_v57 }
0x1ee9   : > { %3183 = vst.msk [vmem:[%s522_s18] sm:$0x1] %vm3182_vm5, %v3181_v12 }
0x1eea   : > { %3753 = shalt.err (!%p3750_p3)
}
0x1eeb   : > { %s3754_s4 = scalar_lea.hbm %s3195_s3, 16  ;;  %s3758_s26 = scalar_lea.hbm %s4435_s16, 32 }
0x1eec   : > { %p3755_p4 = scmp.ne.s32.totalorder %s3195_s3, %s3754_s4  ;;  %p3759_p9 = scmp.lt.s32.totalorder %s3195_s3, %s4435_s16 }
0x1eed   : > { %p3760_p10 = scmp.lt.s32.totalorder %s3758_s26, %s3754_s4 }
0x1eee   : > { %p3756_p7 = pnand %p3755_p4, %p3939_p5 }
0x1eef   : > { %p3761_p11 = por %p3760_p10, %p3759_p9 }
0x1ef0   : > { %p3757_p8 = pneg %p3756_p7 }
0x1ef2   : > { %p3762_p12 = pnand %p3761_p11, %p3757_p8 }
0x1ef4   : > { %3765 = shalt.err (!%p3762_p12)
}
0x1ef5   : > { %3642 = dma.vmem_to_hbm [thread:$0]  (%p3939_p5), %s3198_s19, 16, %s3195_s3, %s3185_s29  }
0x1ef6 PF: > { %p3648_p13 = scmp.ge.s32.totalorder %s3800_s24, 2  ;;  %s3209_s28 = sand.u32 1, %s3788_s21  }
0x1ef7   : > { %s3210_s20 = scalar_lea.sflag [#allocation4], %s3209_s28 }
0x1ef8   : > { %p3645_p0 = pnand %p3648_p13, %p3943_p6 }
0x1efa   : > { %p3646_p1 = pneg %p3645_p0 }
0x1efc   : > { %3783 = dma.done.wait (%p3646_p1), %s3210_s20, 16  }
0x1efd   : > { %3785 = vsyncadd (%p3646_p1), %s3210_s20, 4294967280  ;;  %s4473_s4 = sld [smem:[#allocation6_spill]]  ;;  %p26_p2 = scmp.ge.s32.totalorder %s3926_s27, 4  }
0x1efe   : > { %s4474_s23 = sld [smem:[#allocation7_spill]]  ;;  %s4475_s21 = smov %s3792_s22 }
0x1eff   : > { %s4477_s24 = smov %s3926_s27  ;;  %28 = sbr.rel (!%p26_p2) target bundleno = 9 (0x9), region = 134 }
0x1f03   : > { %s4476_s22 = smov %s4473_s4 }
0x1f04   :  { %3214 = vsyncpa [#allocation4], 1 }
0x1f05   :  { %3216 = vsyncpa [#allocation4 + $0x1], 1 }

</bundles_post_ra>
